<compile_context>
chip_gen: v6e
topology: v6e:2x2x1
jax: 0.10.0
libtpu: 0.0.40
codegen_flags: <defaults>
</compile_context>

<pallas_src>
import math
import numpy as np
import jax
import jax.numpy as jnp
from jax.experimental import pallas as pl
from jax.experimental.pallas import tpu as pltpu


def _glstm_kernel(x_ref, a_ref, h0_ref, c0_ref,
                  wx4_ref, waxo4_ref, bias_ref, wh4_ref, wsel_ref,
                  out_ref):
    """One grid program == one batch element (batch axis is 'parallel')."""
    S, R, P = x_ref.shape
    H = h0_ref.shape[-1]

    # ---------- Hoisted pre-pass: all timesteps, outside the recurrence ----
    x = x_ref[...]                                   # (S, R, P)
    a = a_ref[...]                                   # (S, R, R)
    # a_t @ x_t for every timestep (batched over S).
    ax = jnp.einsum('srq,sqp->srp', a, x, preferred_element_type=jnp.float32)
    # Gate pre-activations for all timesteps:
    #   columns [0:3H]  <- x  @ [W_ii | W_if | W_ig]
    #   columns [3H:4H] <- ax @ (Wn @ W_io)          (bn @ W_io folded in bias)
    pre = (jnp.einsum('srp,ph->srh', x, wx4_ref[...],
                      preferred_element_type=jnp.float32)
           + jnp.einsum('srp,ph->srh', ax, waxo4_ref[...],
                        preferred_element_type=jnp.float32)
           + bias_ref[...])                          # (S, R, 4H)

    wh4 = wh4_ref[...]                               # (H, 4H)
    wsel = wsel_ref[...]                             # (4H, 4H)

    # Activation-selection mask (tanh for the g block), hoisted out of the loop.
    col = jax.lax.broadcasted_iota(jnp.int32, (1, 4 * H), 1)
    is_g = (col >= 2 * H) & (col < 3 * H)

    h = h0_ref[...]                                  # (R, H)
    c = c0_ref[...]                                  # (R, H)

    # ---------- Serial recurrence: only h @ Wh4 + elementwise per step ------
    for t in range(S):                               # S is small & static -> unrolled
        z = pre[t] + jnp.dot(h, wh4, preferred_element_type=jnp.float32)  # (R, 4H)
        acts = jnp.where(is_g, jnp.tanh(z), jax.nn.sigmoid(z))            # i|f|g|o
        # Block-diagonal selector: scaled[:, block] = (gate_block @ W) broadcast
        # over H lanes (g-block rows of wsel are zero -> no contamination).
        scaled = jnp.dot(acts, wsel, preferred_element_type=jnp.float32)  # (R, 4H)
        i_b = scaled[:, 0:H]
        f_b = scaled[:, H:2 * H]
        o_b = scaled[:, 3 * H:4 * H]
        g = acts[:, 2 * H:3 * H]
        c = f_b * c + i_b * g
        h = o_b * jnp.tanh(c)
        out_ref[t] = h


def graph_lstm_forward(x, a, h0, c0, params):
    S, B, R, P = x.shape
    H = h0.shape[-1]
    f32 = jnp.float32

    # Fused / padded weights (built once, outside the kernel).
    wx4 = jnp.concatenate([params['W_ii'], params['W_if'], params['W_ig'],
                           jnp.zeros((P, H), f32)], axis=1)                  # (P, 4H)
    waxo4 = jnp.concatenate([jnp.zeros((P, 3 * H), f32),
                             params['Wn'] @ params['W_io']], axis=1)         # (P, 4H)
    bias = jnp.concatenate([params['b_ii'] + params['b_hi'],
                            params['b_if'] + params['b_hf'],
                            params['b_ig'] + params['b_hg'],
                            params['b_io'] + params['b_ho']
                            + params['bn'] @ params['W_io']], axis=0)[None, :]   # (1, 4H)
    wh4 = jnp.concatenate([params['W_hi'], params['W_hf'],
                           params['W_hg'], params['W_ho']], axis=1)          # (H, 4H)

    # Block-diagonal selector: replaces (gate @ W) -> diag_embed -> matmul with
    # one MXU op that directly yields the row-scale broadcast over H lanes.
    blk = jnp.broadcast_to(params['W'], (H, H))                              # (H, H)
    wsel = jnp.zeros((4 * H, 4 * H), f32)
    wsel = wsel.at[0:H, 0:H].set(blk)              # i
    wsel = wsel.at[H:2 * H, H:2 * H].set(blk)      # f
    wsel = wsel.at[3 * H:4 * H, 3 * H:4 * H].set(blk)  # o  (g block stays zero)

    full2 = lambda b: (0, 0)

    out = pl.pallas_call(
        _glstm_kernel,
        out_shape=jax.ShapeDtypeStruct((S, B, R, H), f32),
        grid_spec=pltpu.PrefetchScalarGridSpec(
            num_scalar_prefetch=0,
            grid=(B,),                                      # batch-parallel
            in_specs=[
                pl.BlockSpec((S, None, R, P), lambda b: (0, b, 0, 0)),   # x
                pl.BlockSpec((S, None, R, R), lambda b: (0, b, 0, 0)),   # a
                pl.BlockSpec((None, R, H), lambda b: (b, 0, 0)),         # h0
                pl.BlockSpec((None, R, H), lambda b: (b, 0, 0)),         # c0
                pl.BlockSpec((P, 4 * H), full2),                         # wx4
                pl.BlockSpec((P, 4 * H), full2),                         # waxo4
                pl.BlockSpec((1, 4 * H), full2),                         # bias
                pl.BlockSpec((H, 4 * H), full2),                         # wh4
                pl.BlockSpec((4 * H, 4 * H), full2),                     # wsel
            ],
            out_specs=pl.BlockSpec((S, None, R, H), lambda b: (0, b, 0, 0)),
        ),
        compiler_params=pltpu.CompilerParams(
            dimension_semantics=("parallel",)),
    )(x, a, h0, c0, wx4, waxo4, bias, wh4, wsel)

    return out.reshape(S, B, R * H)


def reference_forward(x, a, h0, c0, p):
    """Pure-JAX reference matching the PyTorch semantics (num_layers=1)."""
    seq_len = x.shape[0]
    h, c = h0, c0
    outs = []
    for t in range(seq_len):
        x_t, a_t = x[t], a[t]
        ax_t = a_t @ x_t @ p['Wn'] + p['bn']
        i_t = jax.nn.sigmoid(x_t @ p['W_ii'] + p['b_ii'] + h @ p['W_hi'] + p['b_hi'])
        i_v = (i_t @ p['W'])[..., 0]
        f_t = jax.nn.sigmoid(x_t @ p['W_if'] + p['b_if'] + h @ p['W_hf'] + p['b_hf'])
        f_v = (f_t @ p['W'])[..., 0]
        g_t = jnp.tanh(x_t @ p['W_ig'] + p['b_ig'] + h @ p['W_hg'] + p['b_hg'])
        o_t = jax.nn.sigmoid(ax_t @ p['W_io'] + p['b_io'] + h @ p['W_ho'] + p['b_ho'])
        o_v = (o_t @ p['W'])[..., 0]
        c = f_v[..., None] * c + i_v[..., None] * g_t      # diag_embed @ == row scale
        h = o_v[..., None] * jnp.tanh(c)
        outs.append(h)
    out = jnp.stack(outs, axis=0)
    return out.reshape(seq_len, out.shape[1], -1)


if __name__ == "__main__":
    # Small shapes consistent with the module's forward (num_layers = 1).
    seq_len, B = 8, 2
    R, P, H = 8, 8, 32          # data_row, p, hidden_size  (4H = 128 lanes)

    key = jax.random.PRNGKey(0)
    keys = jax.random.split(key, 32)
    stdv = 1.0 / math.sqrt(H)

    def u(k, shape):
        return jax.random.uniform(k, shape, jnp.float32, -stdv, stdv)

    params = {
        'W':    u(keys[0], (H, 1)),
        'Wn':   u(keys[1], (P, P)),
        'bn':   u(keys[2], (P,)),
        'W_ii': u(keys[3], (P, H)), 'W_hi': u(keys[4], (H, H)),
        'b_ii': u(keys[5], (H,)),   'b_hi': u(keys[6], (H,)),
        'W_if': u(keys[7], (P, H)), 'W_hf': u(keys[8], (H, H)),
        'b_if': u(keys[9], (H,)),   'b_hf': u(keys[10], (H,)),
        'W_ig': u(keys[11], (P, H)), 'W_hg': u(keys[12], (H, H)),
        'b_ig': u(keys[13], (H,)),   'b_hg': u(keys[14], (H,)),
        'W_io': u(keys[15], (P, H)), 'W_ho': u(keys[16], (H, H)),
        'b_io': u(keys[17], (H,)),   'b_ho': u(keys[18], (H,)),
    }

    x = jax.random.normal(keys[20], (seq_len, B, R, P), jnp.float32)
    a = jax.random.normal(keys[21], (seq_len, B, R, R), jnp.float32)
    # torch.randn(h0/c0) in the module -> deterministic normals here.
    h0 = jax.random.normal(keys[22], (B, R, H), jnp.float32)
    c0 = jax.random.normal(keys[23], (B, R, H), jnp.float32)

    out = graph_lstm_forward(x, a, h0, c0, params)
    out = jax.block_until_ready(out)

    ref = reference_forward(x, a, h0, c0, params)
    assert out.shape == (seq_len, B, R * H), out.shape
    np.testing.assert_allclose(np.asarray(out), np.asarray(ref),
                               rtol=1e-3, atol=1e-3)
    print("KERNEL_OK")
</pallas_src>

<mosaic_0001>
module attributes {stable_mosaic.version = 11 : i64} {
  func.func @_glstm_kernel(%arg0: i32, %arg1: memref<8x1x8x8xf32, #tpu.memory_space<vmem>>, %arg2: memref<8x1x8x8xf32, #tpu.memory_space<vmem>>, %arg3: memref<1x8x32xf32, #tpu.memory_space<vmem>>, %arg4: memref<1x8x32xf32, #tpu.memory_space<vmem>>, %arg5: memref<8x128xf32, #tpu.memory_space<vmem>>, %arg6: memref<8x128xf32, #tpu.memory_space<vmem>>, %arg7: memref<1x128xf32, #tpu.memory_space<vmem>>, %arg8: memref<32x128xf32, #tpu.memory_space<vmem>>, %arg9: memref<128x128xf32, #tpu.memory_space<vmem>>, %arg10: memref<8x1x8x32xf32, #tpu.memory_space<vmem>>) attributes {dimension_semantics = [#tpu.dimension_semantics<parallel>], iteration_bounds = array<i64: 2>, scalar_prefetch = 0 : i64, scratch_operands = 0 : i64, tpu.core_type = #tpu.core_type<tc>, window_params = [{transform_indices = @transform_0, window_bounds = array<i64: 8, 1, 8, 8>}, {transform_indices = @transform_1, window_bounds = array<i64: 8, 1, 8, 8>}, {transform_indices = @transform_2, window_bounds = array<i64: 1, 8, 32>}, {transform_indices = @transform_3, window_bounds = array<i64: 1, 8, 32>}, {pipeline_mode = #tpu.pipeline_mode<synchronous>, transform_indices = @transform_4, window_bounds = array<i64: 8, 128>}, {pipeline_mode = #tpu.pipeline_mode<synchronous>, transform_indices = @transform_5, window_bounds = array<i64: 8, 128>}, {pipeline_mode = #tpu.pipeline_mode<synchronous>, transform_indices = @transform_6, window_bounds = array<i64: 1, 128>}, {pipeline_mode = #tpu.pipeline_mode<synchronous>, transform_indices = @transform_7, window_bounds = array<i64: 32, 128>}, {pipeline_mode = #tpu.pipeline_mode<synchronous>, transform_indices = @transform_8, window_bounds = array<i64: 128, 128>}, {transform_indices = @transform_9, window_bounds = array<i64: 8, 1, 8, 32>}]} {
    %c0 = arith.constant 0 : index
    %c0_0 = arith.constant 0 : index
    %c0_1 = arith.constant 0 : index
    %c0_2 = arith.constant 0 : index
    %0 = vector.load %arg1[%c0, %c0_0, %c0_1, %c0_2] : memref<8x1x8x8xf32, #tpu.memory_space<vmem>>, vector<8x1x8x8xf32>
    %1 = vector.shape_cast %0 : vector<8x1x8x8xf32> to vector<8x8x8xf32>
    %c0_3 = arith.constant 0 : index
    %c0_4 = arith.constant 0 : index
    %c0_5 = arith.constant 0 : index
    %c0_6 = arith.constant 0 : index
    %2 = vector.load %arg2[%c0_3, %c0_4, %c0_5, %c0_6] : memref<8x1x8x8xf32, #tpu.memory_space<vmem>>, vector<8x1x8x8xf32>
    %3 = vector.shape_cast %2 : vector<8x1x8x8xf32> to vector<8x8x8xf32>
    "tpu.trace_start"() <{level = 10 : i32, message = "srq,sqp->srp"}> : () -> ()
    %cst = arith.constant dense<0.000000e+00> : vector<8x8x8xf32>
    %4 = tpu.matmul %3, %1, %cst {dimension_numbers = #tpu.dot_dimension_numbers<[2], [1], [1], [2], [0, 0, 0, 1, 1, 2], [0], [0]>} : vector<8x8x8xf32>, vector<8x8x8xf32>, vector<8x8x8xf32> -> vector<8x8x8xf32>
    "tpu.trace_stop"() : () -> ()
    %c0_7 = arith.constant 0 : index
    %c0_8 = arith.constant 0 : index
    %5 = vector.load %arg5[%c0_7, %c0_8] : memref<8x128xf32, #tpu.memory_space<vmem>>, vector<8x128xf32>
    "tpu.trace_start"() <{level = 10 : i32, message = "srp,ph->srh"}> : () -> ()
    %cst_9 = arith.constant dense<0.000000e+00> : vector<8x8x128xf32>
    %6 = tpu.matmul %1, %5, %cst_9 {dimension_numbers = #tpu.dot_dimension_numbers<[2], [0], [0, 1], [1], [0, 0, 0, 1, 1, 1], [], []>} : vector<8x8x8xf32>, vector<8x128xf32>, vector<8x8x128xf32> -> vector<8x8x128xf32>
    "tpu.trace_stop"() : () -> ()
    %c0_10 = arith.constant 0 : index
    %c0_11 = arith.constant 0 : index
    %7 = vector.load %arg6[%c0_10, %c0_11] : memref<8x128xf32, #tpu.memory_space<vmem>>, vector<8x128xf32>
    "tpu.trace_start"() <{level = 10 : i32, message = "srp,ph->srh"}> : () -> ()
    %cst_12 = arith.constant dense<0.000000e+00> : vector<8x8x128xf32>
    %8 = tpu.matmul %4, %7, %cst_12 {dimension_numbers = #tpu.dot_dimension_numbers<[2], [0], [0, 1], [1], [0, 0, 0, 1, 1, 1], [], []>} : vector<8x8x8xf32>, vector<8x128xf32>, vector<8x8x128xf32> -> vector<8x8x128xf32>
    "tpu.trace_stop"() : () -> ()
    %9 = arith.addf %6, %8 : vector<8x8x128xf32>
    %c0_13 = arith.constant 0 : index
    %c0_14 = arith.constant 0 : index
    %10 = vector.load %arg7[%c0_13, %c0_14] : memref<1x128xf32, #tpu.memory_space<vmem>>, vector<1x128xf32>
    %11 = vector.shape_cast %10 : vector<1x128xf32> to vector<1x1x128xf32>
    %12 = vector.broadcast %11 : vector<1x1x128xf32> to vector<8x8x128xf32>
    %13 = arith.addf %9, %12 : vector<8x8x128xf32>
    %c0_15 = arith.constant 0 : index
    %c0_16 = arith.constant 0 : index
    %14 = vector.load %arg8[%c0_15, %c0_16] : memref<32x128xf32, #tpu.memory_space<vmem>>, vector<32x128xf32>
    %c0_17 = arith.constant 0 : index
    %c0_18 = arith.constant 0 : index
    %15 = vector.load %arg9[%c0_17, %c0_18] : memref<128x128xf32, #tpu.memory_space<vmem>>, vector<128x128xf32>
    %16 = tpu.iota {dimensions = array<i32: 1>} : vector<1x128xi32>
    %c64_i32 = arith.constant 64 : i32
    %17 = vector.broadcast %c64_i32 : i32 to vector<1x128xi32>
    %18 = arith.cmpi sge, %16, %17 : vector<1x128xi32>
    %c96_i32 = arith.constant 96 : i32
    %19 = vector.broadcast %c96_i32 : i32 to vector<1x128xi32>
    %20 = arith.cmpi slt, %16, %19 : vector<1x128xi32>
    %21 = arith.andi %18, %20 : vector<1x128xi1>
    %c0_19 = arith.constant 0 : index
    %c0_20 = arith.constant 0 : index
    %c0_21 = arith.constant 0 : index
    %22 = vector.load %arg3[%c0_19, %c0_20, %c0_21] : memref<1x8x32xf32, #tpu.memory_space<vmem>>, vector<1x8x32xf32>
    %23 = vector.shape_cast %22 : vector<1x8x32xf32> to vector<8x32xf32>
    %c0_22 = arith.constant 0 : index
    %c0_23 = arith.constant 0 : index
    %c0_24 = arith.constant 0 : index
    %24 = vector.load %arg4[%c0_22, %c0_23, %c0_24] : memref<1x8x32xf32, #tpu.memory_space<vmem>>, vector<1x8x32xf32>
    %25 = vector.shape_cast %24 : vector<1x8x32xf32> to vector<8x32xf32>
    %26 = vector.extract_strided_slice %13 {offsets = [0, 0, 0], sizes = [1, 8, 128], strides = [1, 1, 1]} : vector<8x8x128xf32> to vector<1x8x128xf32>
    %27 = vector.shape_cast %26 : vector<1x8x128xf32> to vector<8x128xf32>
    %cst_25 = arith.constant dense<0.000000e+00> : vector<8x128xf32>
    %28 = tpu.matmul %23, %14, %cst_25 {dimension_numbers = #tpu.dot_dimension_numbers<[1], [0], [0], [1], [0, 0, 1, 1], [], []>} : vector<8x32xf32>, vector<32x128xf32>, vector<8x128xf32> -> vector<8x128xf32>
    %29 = arith.addf %27, %28 : vector<8x128xf32>
    %30 = math.tanh %29 : vector<8x128xf32>
    %31 = arith.negf %29 : vector<8x128xf32>
    %32 = math.exp %31 : vector<8x128xf32>
    %cst_26 = arith.constant 1.000000e+00 : f32
    %33 = vector.broadcast %cst_26 : f32 to vector<8x128xf32>
    %34 = arith.addf %33, %32 : vector<8x128xf32>
    %35 = arith.divf %33, %34 : vector<8x128xf32>
    %36 = vector.shape_cast %21 : vector<1x128xi1> to vector<1x128xi1>
    %37 = vector.broadcast %36 : vector<1x128xi1> to vector<8x128xi1>
    %38 = arith.select %37, %30, %35 : vector<8x128xi1>, vector<8x128xf32>
    %cst_27 = arith.constant dense<0.000000e+00> : vector<8x128xf32>
    %39 = tpu.matmul %38, %15, %cst_27 {dimension_numbers = #tpu.dot_dimension_numbers<[1], [0], [0], [1], [0, 0, 1, 1], [], []>} : vector<8x128xf32>, vector<128x128xf32>, vector<8x128xf32> -> vector<8x128xf32>
    %40 = vector.extract_strided_slice %39 {offsets = [0, 0], sizes = [8, 32], strides = [1, 1]} : vector<8x128xf32> to vector<8x32xf32>
    %41 = vector.extract_strided_slice %39 {offsets = [0, 32], sizes = [8, 32], strides = [1, 1]} : vector<8x128xf32> to vector<8x32xf32>
    %42 = vector.extract_strided_slice %39 {offsets = [0, 96], sizes = [8, 32], strides = [1, 1]} : vector<8x128xf32> to vector<8x32xf32>
    %43 = vector.extract_strided_slice %38 {offsets = [0, 64], sizes = [8, 32], strides = [1, 1]} : vector<8x128xf32> to vector<8x32xf32>
    %44 = arith.mulf %41, %25 : vector<8x32xf32>
    %45 = arith.mulf %40, %43 : vector<8x32xf32>
    %46 = arith.addf %44, %45 : vector<8x32xf32>
    %47 = math.tanh %46 : vector<8x32xf32>
    %48 = arith.mulf %42, %47 : vector<8x32xf32>
    %c0_28 = arith.constant 0 : index
    %c0_29 = arith.constant 0 : index
    %c0_30 = arith.constant 0 : index
    %c0_31 = arith.constant 0 : index
    %49 = vector.load %arg10[%c0_28, %c0_29, %c0_30, %c0_31] : memref<8x1x8x32xf32, #tpu.memory_space<vmem>>, vector<1x1x8x32xf32>
    %50 = vector.shape_cast %49 : vector<1x1x8x32xf32> to vector<8x32xf32>
    %51 = vector.shape_cast %48 : vector<8x32xf32> to vector<1x1x8x32xf32>
    tpu.vector_store %arg10[%c0_28, %c0_29, %c0_30, %c0_31], %51 {strides = array<i32>} : memref<8x1x8x32xf32, #tpu.memory_space<vmem>>, vector<1x1x8x32xf32>,
    %52 = vector.extract_strided_slice %13 {offsets = [1, 0, 0], sizes = [1, 8, 128], strides = [1, 1, 1]} : vector<8x8x128xf32> to vector<1x8x128xf32>
    %53 = vector.shape_cast %52 : vector<1x8x128xf32> to vector<8x128xf32>
    %cst_32 = arith.constant dense<0.000000e+00> : vector<8x128xf32>
    %54 = tpu.matmul %48, %14, %cst_32 {dimension_numbers = #tpu.dot_dimension_numbers<[1], [0], [0], [1], [0, 0, 1, 1], [], []>} : vector<8x32xf32>, vector<32x128xf32>, vector<8x128xf32> -> vector<8x128xf32>
    %55 = arith.addf %53, %54 : vector<8x128xf32>
    %56 = math.tanh %55 : vector<8x128xf32>
    %57 = arith.negf %55 : vector<8x128xf32>
    %58 = math.exp %57 : vector<8x128xf32>
    %cst_33 = arith.constant 1.000000e+00 : f32
    %59 = vector.broadcast %cst_33 : f32 to vector<8x128xf32>
    %60 = arith.addf %59, %58 : vector<8x128xf32>
    %61 = arith.divf %59, %60 : vector<8x128xf32>
    %62 = vector.shape_cast %21 : vector<1x128xi1> to vector<1x128xi1>
    %63 = vector.broadcast %62 : vector<1x128xi1> to vector<8x128xi1>
    %64 = arith.select %63, %56, %61 : vector<8x128xi1>, vector<8x128xf32>
    %cst_34 = arith.constant dense<0.000000e+00> : vector<8x128xf32>
    %65 = tpu.matmul %64, %15, %cst_34 {dimension_numbers = #tpu.dot_dimension_numbers<[1], [0], [0], [1], [0, 0, 1, 1], [], []>} : vector<8x128xf32>, vector<128x128xf32>, vector<8x128xf32> -> vector<8x128xf32>
    %66 = vector.extract_strided_slice %65 {offsets = [0, 0], sizes = [8, 32], strides = [1, 1]} : vector<8x128xf32> to vector<8x32xf32>
    %67 = vector.extract_strided_slice %65 {offsets = [0, 32], sizes = [8, 32], strides = [1, 1]} : vector<8x128xf32> to vector<8x32xf32>
    %68 = vector.extract_strided_slice %65 {offsets = [0, 96], sizes = [8, 32], strides = [1, 1]} : vector<8x128xf32> to vector<8x32xf32>
    %69 = vector.extract_strided_slice %64 {offsets = [0, 64], sizes = [8, 32], strides = [1, 1]} : vector<8x128xf32> to vector<8x32xf32>
    %70 = arith.mulf %67, %46 : vector<8x32xf32>
    %71 = arith.mulf %66, %69 : vector<8x32xf32>
    %72 = arith.addf %70, %71 : vector<8x32xf32>
    %73 = math.tanh %72 : vector<8x32xf32>
    %74 = arith.mulf %68, %73 : vector<8x32xf32>
    %c1 = arith.constant 1 : index
    %c0_35 = arith.constant 0 : index
    %c0_36 = arith.constant 0 : index
    %c0_37 = arith.constant 0 : index
    %75 = vector.load %arg10[%c1, %c0_35, %c0_36, %c0_37] : memref<8x1x8x32xf32, #tpu.memory_space<vmem>>, vector<1x1x8x32xf32>
    %76 = vector.shape_cast %75 : vector<1x1x8x32xf32> to vector<8x32xf32>
    %77 = vector.shape_cast %74 : vector<8x32xf32> to vector<1x1x8x32xf32>
    tpu.vector_store %arg10[%c1, %c0_35, %c0_36, %c0_37], %77 {strides = array<i32>} : memref<8x1x8x32xf32, #tpu.memory_space<vmem>>, vector<1x1x8x32xf32>,
    %78 = vector.extract_strided_slice %13 {offsets = [2, 0, 0], sizes = [1, 8, 128], strides = [1, 1, 1]} : vector<8x8x128xf32> to vector<1x8x128xf32>
    %79 = vector.shape_cast %78 : vector<1x8x128xf32> to vector<8x128xf32>
    %cst_38 = arith.constant dense<0.000000e+00> : vector<8x128xf32>
    %80 = tpu.matmul %74, %14, %cst_38 {dimension_numbers = #tpu.dot_dimension_numbers<[1], [0], [0], [1], [0, 0, 1, 1], [], []>} : vector<8x32xf32>, vector<32x128xf32>, vector<8x128xf32> -> vector<8x128xf32>
    %81 = arith.addf %79, %80 : vector<8x128xf32>
    %82 = math.tanh %81 : vector<8x128xf32>
    %83 = arith.negf %81 : vector<8x128xf32>
    %84 = math.exp %83 : vector<8x128xf32>
    %cst_39 = arith.constant 1.000000e+00 : f32
    %85 = vector.broadcast %cst_39 : f32 to vector<8x128xf32>
    %86 = arith.addf %85, %84 : vector<8x128xf32>
    %87 = arith.divf %85, %86 : vector<8x128xf32>
    %88 = vector.shape_cast %21 : vector<1x128xi1> to vector<1x128xi1>
    %89 = vector.broadcast %88 : vector<1x128xi1> to vector<8x128xi1>
    %90 = arith.select %89, %82, %87 : vector<8x128xi1>, vector<8x128xf32>
    %cst_40 = arith.constant dense<0.000000e+00> : vector<8x128xf32>
    %91 = tpu.matmul %90, %15, %cst_40 {dimension_numbers = #tpu.dot_dimension_numbers<[1], [0], [0], [1], [0, 0, 1, 1], [], []>} : vector<8x128xf32>, vector<128x128xf32>, vector<8x128xf32> -> vector<8x128xf32>
    %92 = vector.extract_strided_slice %91 {offsets = [0, 0], sizes = [8, 32], strides = [1, 1]} : vector<8x128xf32> to vector<8x32xf32>
    %93 = vector.extract_strided_slice %91 {offsets = [0, 32], sizes = [8, 32], strides = [1, 1]} : vector<8x128xf32> to vector<8x32xf32>
    %94 = vector.extract_strided_slice %91 {offsets = [0, 96], sizes = [8, 32], strides = [1, 1]} : vector<8x128xf32> to vector<8x32xf32>
    %95 = vector.extract_strided_slice %90 {offsets = [0, 64], sizes = [8, 32], strides = [1, 1]} : vector<8x128xf32> to vector<8x32xf32>
    %96 = arith.mulf %93, %72 : vector<8x32xf32>
    %97 = arith.mulf %92, %95 : vector<8x32xf32>
    %98 = arith.addf %96, %97 : vector<8x32xf32>
    %99 = math.tanh %98 : vector<8x32xf32>
    %100 = arith.mulf %94, %99 : vector<8x32xf32>
    %c2 = arith.constant 2 : index
    %c0_41 = arith.constant 0 : index
    %c0_42 = arith.constant 0 : index
    %c0_43 = arith.constant 0 : index
    %101 = vector.load %arg10[%c2, %c0_41, %c0_42, %c0_43] : memref<8x1x8x32xf32, #tpu.memory_space<vmem>>, vector<1x1x8x32xf32>
    %102 = vector.shape_cast %101 : vector<1x1x8x32xf32> to vector<8x32xf32>
    %103 = vector.shape_cast %100 : vector<8x32xf32> to vector<1x1x8x32xf32>
    tpu.vector_store %arg10[%c2, %c0_41, %c0_42, %c0_43], %103 {strides = array<i32>} : memref<8x1x8x32xf32, #tpu.memory_space<vmem>>, vector<1x1x8x32xf32>,
    %104 = vector.extract_strided_slice %13 {offsets = [3, 0, 0], sizes = [1, 8, 128], strides = [1, 1, 1]} : vector<8x8x128xf32> to vector<1x8x128xf32>
    %105 = vector.shape_cast %104 : vector<1x8x128xf32> to vector<8x128xf32>
    %cst_44 = arith.constant dense<0.000000e+00> : vector<8x128xf32>
    %106 = tpu.matmul %100, %14, %cst_44 {dimension_numbers = #tpu.dot_dimension_numbers<[1], [0], [0], [1], [0, 0, 1, 1], [], []>} : vector<8x32xf32>, vector<32x128xf32>, vector<8x128xf32> -> vector<8x128xf32>
    %107 = arith.addf %105, %106 : vector<8x128xf32>
    %108 = math.tanh %107 : vector<8x128xf32>
    %109 = arith.negf %107 : vector<8x128xf32>
    %110 = math.exp %109 : vector<8x128xf32>
    %cst_45 = arith.constant 1.000000e+00 : f32
    %111 = vector.broadcast %cst_45 : f32 to vector<8x128xf32>
    %112 = arith.addf %111, %110 : vector<8x128xf32>
    %113 = arith.divf %111, %112 : vector<8x128xf32>
    %114 = vector.shape_cast %21 : vector<1x128xi1> to vector<1x128xi1>
    %115 = vector.broadcast %114 : vector<1x128xi1> to vector<8x128xi1>
    %116 = arith.select %115, %108, %113 : vector<8x128xi1>, vector<8x128xf32>
    %cst_46 = arith.constant dense<0.000000e+00> : vector<8x128xf32>
    %117 = tpu.matmul %116, %15, %cst_46 {dimension_numbers = #tpu.dot_dimension_numbers<[1], [0], [0], [1], [0, 0, 1, 1], [], []>} : vector<8x128xf32>, vector<128x128xf32>, vector<8x128xf32> -> vector<8x128xf32>
    %118 = vector.extract_strided_slice %117 {offsets = [0, 0], sizes = [8, 32], strides = [1, 1]} : vector<8x128xf32> to vector<8x32xf32>
    %119 = vector.extract_strided_slice %117 {offsets = [0, 32], sizes = [8, 32], strides = [1, 1]} : vector<8x128xf32> to vector<8x32xf32>
    %120 = vector.extract_strided_slice %117 {offsets = [0, 96], sizes = [8, 32], strides = [1, 1]} : vector<8x128xf32> to vector<8x32xf32>
    %121 = vector.extract_strided_slice %116 {offsets = [0, 64], sizes = [8, 32], strides = [1, 1]} : vector<8x128xf32> to vector<8x32xf32>
    %122 = arith.mulf %119, %98 : vector<8x32xf32>
    %123 = arith.mulf %118, %121 : vector<8x32xf32>
    %124 = arith.addf %122, %123 : vector<8x32xf32>
    %125 = math.tanh %124 : vector<8x32xf32>
    %126 = arith.mulf %120, %125 : vector<8x32xf32>
    %c3 = arith.constant 3 : index
    %c0_47 = arith.constant 0 : index
    %c0_48 = arith.constant 0 : index
    %c0_49 = arith.constant 0 : index
    %127 = vector.load %arg10[%c3, %c0_47, %c0_48, %c0_49] : memref<8x1x8x32xf32, #tpu.memory_space<vmem>>, vector<1x1x8x32xf32>
    %128 = vector.shape_cast %127 : vector<1x1x8x32xf32> to vector<8x32xf32>
    %129 = vector.shape_cast %126 : vector<8x32xf32> to vector<1x1x8x32xf32>
    tpu.vector_store %arg10[%c3, %c0_47, %c0_48, %c0_49], %129 {strides = array<i32>} : memref<8x1x8x32xf32, #tpu.memory_space<vmem>>, vector<1x1x8x32xf32>,
    %130 = vector.extract_strided_slice %13 {offsets = [4, 0, 0], sizes = [1, 8, 128], strides = [1, 1, 1]} : vector<8x8x128xf32> to vector<1x8x128xf32>
    %131 = vector.shape_cast %130 : vector<1x8x128xf32> to vector<8x128xf32>
    %cst_50 = arith.constant dense<0.000000e+00> : vector<8x128xf32>
    %132 = tpu.matmul %126, %14, %cst_50 {dimension_numbers = #tpu.dot_dimension_numbers<[1], [0], [0], [1], [0, 0, 1, 1], [], []>} : vector<8x32xf32>, vector<32x128xf32>, vector<8x128xf32> -> vector<8x128xf32>
    %133 = arith.addf %131, %132 : vector<8x128xf32>
    %134 = math.tanh %133 : vector<8x128xf32>
    %135 = arith.negf %133 : vector<8x128xf32>
    %136 = math.exp %135 : vector<8x128xf32>
    %cst_51 = arith.constant 1.000000e+00 : f32
    %137 = vector.broadcast %cst_51 : f32 to vector<8x128xf32>
    %138 = arith.addf %137, %136 : vector<8x128xf32>
    %139 = arith.divf %137, %138 : vector<8x128xf32>
    %140 = vector.shape_cast %21 : vector<1x128xi1> to vector<1x128xi1>
    %141 = vector.broadcast %140 : vector<1x128xi1> to vector<8x128xi1>
    %142 = arith.select %141, %134, %139 : vector<8x128xi1>, vector<8x128xf32>
    %cst_52 = arith.constant dense<0.000000e+00> : vector<8x128xf32>
    %143 = tpu.matmul %142, %15, %cst_52 {dimension_numbers = #tpu.dot_dimension_numbers<[1], [0], [0], [1], [0, 0, 1, 1], [], []>} : vector<8x128xf32>, vector<128x128xf32>, vector<8x128xf32> -> vector<8x128xf32>
    %144 = vector.extract_strided_slice %143 {offsets = [0, 0], sizes = [8, 32], strides = [1, 1]} : vector<8x128xf32> to vector<8x32xf32>
    %145 = vector.extract_strided_slice %143 {offsets = [0, 32], sizes = [8, 32], strides = [1, 1]} : vector<8x128xf32> to vector<8x32xf32>
    %146 = vector.extract_strided_slice %143 {offsets = [0, 96], sizes = [8, 32], strides = [1, 1]} : vector<8x128xf32> to vector<8x32xf32>
    %147 = vector.extract_strided_slice %142 {offsets = [0, 64], sizes = [8, 32], strides = [1, 1]} : vector<8x128xf32> to vector<8x32xf32>
    %148 = arith.mulf %145, %124 : vector<8x32xf32>
    %149 = arith.mulf %144, %147 : vector<8x32xf32>
    %150 = arith.addf %148, %149 : vector<8x32xf32>
    %151 = math.tanh %150 : vector<8x32xf32>
    %152 = arith.mulf %146, %151 : vector<8x32xf32>
    %c4 = arith.constant 4 : index
    %c0_53 = arith.constant 0 : index
    %c0_54 = arith.constant 0 : index
    %c0_55 = arith.constant 0 : index
    %153 = vector.load %arg10[%c4, %c0_53, %c0_54, %c0_55] : memref<8x1x8x32xf32, #tpu.memory_space<vmem>>, vector<1x1x8x32xf32>
    %154 = vector.shape_cast %153 : vector<1x1x8x32xf32> to vector<8x32xf32>
    %155 = vector.shape_cast %152 : vector<8x32xf32> to vector<1x1x8x32xf32>
    tpu.vector_store %arg10[%c4, %c0_53, %c0_54, %c0_55], %155 {strides = array<i32>} : memref<8x1x8x32xf32, #tpu.memory_space<vmem>>, vector<1x1x8x32xf32>,
    %156 = vector.extract_strided_slice %13 {offsets = [5, 0, 0], sizes = [1, 8, 128], strides = [1, 1, 1]} : vector<8x8x128xf32> to vector<1x8x128xf32>
    %157 = vector.shape_cast %156 : vector<1x8x128xf32> to vector<8x128xf32>
    %cst_56 = arith.constant dense<0.000000e+00> : vector<8x128xf32>
    %158 = tpu.matmul %152, %14, %cst_56 {dimension_numbers = #tpu.dot_dimension_numbers<[1], [0], [0], [1], [0, 0, 1, 1], [], []>} : vector<8x32xf32>, vector<32x128xf32>, vector<8x128xf32> -> vector<8x128xf32>
    %159 = arith.addf %157, %158 : vector<8x128xf32>
    %160 = math.tanh %159 : vector<8x128xf32>
    %161 = arith.negf %159 : vector<8x128xf32>
    %162 = math.exp %161 : vector<8x128xf32>
    %cst_57 = arith.constant 1.000000e+00 : f32
    %163 = vector.broadcast %cst_57 : f32 to vector<8x128xf32>
    %164 = arith.addf %163, %162 : vector<8x128xf32>
    %165 = arith.divf %163, %164 : vector<8x128xf32>
    %166 = vector.shape_cast %21 : vector<1x128xi1> to vector<1x128xi1>
    %167 = vector.broadcast %166 : vector<1x128xi1> to vector<8x128xi1>
    %168 = arith.select %167, %160, %165 : vector<8x128xi1>, vector<8x128xf32>
    %cst_58 = arith.constant dense<0.000000e+00> : vector<8x128xf32>
    %169 = tpu.matmul %168, %15, %cst_58 {dimension_numbers = #tpu.dot_dimension_numbers<[1], [0], [0], [1], [0, 0, 1, 1], [], []>} : vector<8x128xf32>, vector<128x128xf32>, vector<8x128xf32> -> vector<8x128xf32>
    %170 = vector.extract_strided_slice %169 {offsets = [0, 0], sizes = [8, 32], strides = [1, 1]} : vector<8x128xf32> to vector<8x32xf32>
    %171 = vector.extract_strided_slice %169 {offsets = [0, 32], sizes = [8, 32], strides = [1, 1]} : vector<8x128xf32> to vector<8x32xf32>
    %172 = vector.extract_strided_slice %169 {offsets = [0, 96], sizes = [8, 32], strides = [1, 1]} : vector<8x128xf32> to vector<8x32xf32>
    %173 = vector.extract_strided_slice %168 {offsets = [0, 64], sizes = [8, 32], strides = [1, 1]} : vector<8x128xf32> to vector<8x32xf32>
    %174 = arith.mulf %171, %150 : vector<8x32xf32>
    %175 = arith.mulf %170, %173 : vector<8x32xf32>
    %176 = arith.addf %174, %175 : vector<8x32xf32>
    %177 = math.tanh %176 : vector<8x32xf32>
    %178 = arith.mulf %172, %177 : vector<8x32xf32>
    %c5 = arith.constant 5 : index
    %c0_59 = arith.constant 0 : index
    %c0_60 = arith.constant 0 : index
    %c0_61 = arith.constant 0 : index
    %179 = vector.load %arg10[%c5, %c0_59, %c0_60, %c0_61] : memref<8x1x8x32xf32, #tpu.memory_space<vmem>>, vector<1x1x8x32xf32>
    %180 = vector.shape_cast %179 : vector<1x1x8x32xf32> to vector<8x32xf32>
    %181 = vector.shape_cast %178 : vector<8x32xf32> to vector<1x1x8x32xf32>
    tpu.vector_store %arg10[%c5, %c0_59, %c0_60, %c0_61], %181 {strides = array<i32>} : memref<8x1x8x32xf32, #tpu.memory_space<vmem>>, vector<1x1x8x32xf32>,
    %182 = vector.extract_strided_slice %13 {offsets = [6, 0, 0], sizes = [1, 8, 128], strides = [1, 1, 1]} : vector<8x8x128xf32> to vector<1x8x128xf32>
    %183 = vector.shape_cast %182 : vector<1x8x128xf32> to vector<8x128xf32>
    %cst_62 = arith.constant dense<0.000000e+00> : vector<8x128xf32>
    %184 = tpu.matmul %178, %14, %cst_62 {dimension_numbers = #tpu.dot_dimension_numbers<[1], [0], [0], [1], [0, 0, 1, 1], [], []>} : vector<8x32xf32>, vector<32x128xf32>, vector<8x128xf32> -> vector<8x128xf32>
    %185 = arith.addf %183, %184 : vector<8x128xf32>
    %186 = math.tanh %185 : vector<8x128xf32>
    %187 = arith.negf %185 : vector<8x128xf32>
    %188 = math.exp %187 : vector<8x128xf32>
    %cst_63 = arith.constant 1.000000e+00 : f32
    %189 = vector.broadcast %cst_63 : f32 to vector<8x128xf32>
    %190 = arith.addf %189, %188 : vector<8x128xf32>
    %191 = arith.divf %189, %190 : vector<8x128xf32>
    %192 = vector.shape_cast %21 : vector<1x128xi1> to vector<1x128xi1>
    %193 = vector.broadcast %192 : vector<1x128xi1> to vector<8x128xi1>
    %194 = arith.select %193, %186, %191 : vector<8x128xi1>, vector<8x128xf32>
    %cst_64 = arith.constant dense<0.000000e+00> : vector<8x128xf32>
    %195 = tpu.matmul %194, %15, %cst_64 {dimension_numbers = #tpu.dot_dimension_numbers<[1], [0], [0], [1], [0, 0, 1, 1], [], []>} : vector<8x128xf32>, vector<128x128xf32>, vector<8x128xf32> -> vector<8x128xf32>
    %196 = vector.extract_strided_slice %195 {offsets = [0, 0], sizes = [8, 32], strides = [1, 1]} : vector<8x128xf32> to vector<8x32xf32>
    %197 = vector.extract_strided_slice %195 {offsets = [0, 32], sizes = [8, 32], strides = [1, 1]} : vector<8x128xf32> to vector<8x32xf32>
    %198 = vector.extract_strided_slice %195 {offsets = [0, 96], sizes = [8, 32], strides = [1, 1]} : vector<8x128xf32> to vector<8x32xf32>
    %199 = vector.extract_strided_slice %194 {offsets = [0, 64], sizes = [8, 32], strides = [1, 1]} : vector<8x128xf32> to vector<8x32xf32>
    %200 = arith.mulf %197, %176 : vector<8x32xf32>
    %201 = arith.mulf %196, %199 : vector<8x32xf32>
    %202 = arith.addf %200, %201 : vector<8x32xf32>
    %203 = math.tanh %202 : vector<8x32xf32>
    %204 = arith.mulf %198, %203 : vector<8x32xf32>
    %c6 = arith.constant 6 : index
    %c0_65 = arith.constant 0 : index
    %c0_66 = arith.constant 0 : index
    %c0_67 = arith.constant 0 : index
    %205 = vector.load %arg10[%c6, %c0_65, %c0_66, %c0_67] : memref<8x1x8x32xf32, #tpu.memory_space<vmem>>, vector<1x1x8x32xf32>
    %206 = vector.shape_cast %205 : vector<1x1x8x32xf32> to vector<8x32xf32>
    %207 = vector.shape_cast %204 : vector<8x32xf32> to vector<1x1x8x32xf32>
    tpu.vector_store %arg10[%c6, %c0_65, %c0_66, %c0_67], %207 {strides = array<i32>} : memref<8x1x8x32xf32, #tpu.memory_space<vmem>>, vector<1x1x8x32xf32>,
    %208 = vector.extract_strided_slice %13 {offsets = [7, 0, 0], sizes = [1, 8, 128], strides = [1, 1, 1]} : vector<8x8x128xf32> to vector<1x8x128xf32>
    %209 = vector.shape_cast %208 : vector<1x8x128xf32> to vector<8x128xf32>
    %cst_68 = arith.constant dense<0.000000e+00> : vector<8x128xf32>
    %210 = tpu.matmul %204, %14, %cst_68 {dimension_numbers = #tpu.dot_dimension_numbers<[1], [0], [0], [1], [0, 0, 1, 1], [], []>} : vector<8x32xf32>, vector<32x128xf32>, vector<8x128xf32> -> vector<8x128xf32>
    %211 = arith.addf %209, %210 : vector<8x128xf32>
    %212 = math.tanh %211 : vector<8x128xf32>
    %213 = arith.negf %211 : vector<8x128xf32>
    %214 = math.exp %213 : vector<8x128xf32>
    %cst_69 = arith.constant 1.000000e+00 : f32
    %215 = vector.broadcast %cst_69 : f32 to vector<8x128xf32>
    %216 = arith.addf %215, %214 : vector<8x128xf32>
    %217 = arith.divf %215, %216 : vector<8x128xf32>
    %218 = vector.shape_cast %21 : vector<1x128xi1> to vector<1x128xi1>
    %219 = vector.broadcast %218 : vector<1x128xi1> to vector<8x128xi1>
    %220 = arith.select %219, %212, %217 : vector<8x128xi1>, vector<8x128xf32>
    %cst_70 = arith.constant dense<0.000000e+00> : vector<8x128xf32>
    %221 = tpu.matmul %220, %15, %cst_70 {dimension_numbers = #tpu.dot_dimension_numbers<[1], [0], [0], [1], [0, 0, 1, 1], [], []>} : vector<8x128xf32>, vector<128x128xf32>, vector<8x128xf32> -> vector<8x128xf32>
    %222 = vector.extract_strided_slice %221 {offsets = [0, 0], sizes = [8, 32], strides = [1, 1]} : vector<8x128xf32> to vector<8x32xf32>
    %223 = vector.extract_strided_slice %221 {offsets = [0, 32], sizes = [8, 32], strides = [1, 1]} : vector<8x128xf32> to vector<8x32xf32>
    %224 = vector.extract_strided_slice %221 {offsets = [0, 96], sizes = [8, 32], strides = [1, 1]} : vector<8x128xf32> to vector<8x32xf32>
    %225 = vector.extract_strided_slice %220 {offsets = [0, 64], sizes = [8, 32], strides = [1, 1]} : vector<8x128xf32> to vector<8x32xf32>
    %226 = arith.mulf %223, %202 : vector<8x32xf32>
    %227 = arith.mulf %222, %225 : vector<8x32xf32>
    %228 = arith.addf %226, %227 : vector<8x32xf32>
    %229 = math.tanh %228 : vector<8x32xf32>
    %230 = arith.mulf %224, %229 : vector<8x32xf32>
    %c7 = arith.constant 7 : index
    %c0_71 = arith.constant 0 : index
    %c0_72 = arith.constant 0 : index
    %c0_73 = arith.constant 0 : index
    %231 = vector.load %arg10[%c7, %c0_71, %c0_72, %c0_73] : memref<8x1x8x32xf32, #tpu.memory_space<vmem>>, vector<1x1x8x32xf32>
    %232 = vector.shape_cast %231 : vector<1x1x8x32xf32> to vector<8x32xf32>
    %233 = vector.shape_cast %230 : vector<8x32xf32> to vector<1x1x8x32xf32>
    tpu.vector_store %arg10[%c7, %c0_71, %c0_72, %c0_73], %233 {strides = array<i32>} : memref<8x1x8x32xf32, #tpu.memory_space<vmem>>, vector<1x1x8x32xf32>,
    return
  }
  func.func @transform_0(%arg0: i32) -> (i32, i32, i32, i32) {
    %c0_i32 = arith.constant 0 : i32
    %c0_i32_0 = arith.constant 0 : i32
    %c0_i32_1 = arith.constant 0 : i32
    %c0_i32_2 = arith.constant 0 : i32
    return %c0_i32, %arg0, %c0_i32_0, %c0_i32_1 : i32, i32, i32, i32
  }
  func.func @transform_1(%arg0: i32) -> (i32, i32, i32, i32) {
    %c0_i32 = arith.constant 0 : i32
    %c0_i32_0 = arith.constant 0 : i32
    %c0_i32_1 = arith.constant 0 : i32
    %c0_i32_2 = arith.constant 0 : i32
    return %c0_i32, %arg0, %c0_i32_0, %c0_i32_1 : i32, i32, i32, i32
  }
  func.func @transform_2(%arg0: i32) -> (i32, i32, i32) {
    %c0_i32 = arith.constant 0 : i32
    %c0_i32_0 = arith.constant 0 : i32
    %c0_i32_1 = arith.constant 0 : i32
    return %arg0, %c0_i32, %c0_i32_0 : i32, i32, i32
  }
  func.func @transform_3(%arg0: i32) -> (i32, i32, i32) {
    %c0_i32 = arith.constant 0 : i32
    %c0_i32_0 = arith.constant 0 : i32
    %c0_i32_1 = arith.constant 0 : i32
    return %arg0, %c0_i32, %c0_i32_0 : i32, i32, i32
  }
  func.func @transform_4(%arg0: i32) -> (i32, i32) {
    %c0_i32 = arith.constant 0 : i32
    %c0_i32_0 = arith.constant 0 : i32
    %c0_i32_1 = arith.constant 0 : i32
    return %c0_i32, %c0_i32_0 : i32, i32
  }
  func.func @transform_5(%arg0: i32) -> (i32, i32) {
    %c0_i32 = arith.constant 0 : i32
    %c0_i32_0 = arith.constant 0 : i32
    %c0_i32_1 = arith.constant 0 : i32
    return %c0_i32, %c0_i32_0 : i32, i32
  }
  func.func @transform_6(%arg0: i32) -> (i32, i32) {
    %c0_i32 = arith.constant 0 : i32
    %c0_i32_0 = arith.constant 0 : i32
    %c0_i32_1 = arith.constant 0 : i32
    return %c0_i32, %c0_i32_0 : i32, i32
  }
  func.func @transform_7(%arg0: i32) -> (i32, i32) {
    %c0_i32 = arith.constant 0 : i32
    %c0_i32_0 = arith.constant 0 : i32
    %c0_i32_1 = arith.constant 0 : i32
    return %c0_i32, %c0_i32_0 : i32, i32
  }
  func.func @transform_8(%arg0: i32) -> (i32, i32) {
    %c0_i32 = arith.constant 0 : i32
    %c0_i32_0 = arith.constant 0 : i32
    %c0_i32_1 = arith.constant 0 : i32
    return %c0_i32, %c0_i32_0 : i32, i32
  }
  func.func @transform_9(%arg0: i32) -> (i32, i32, i32, i32) {
    %c0_i32 = arith.constant 0 : i32
    %c0_i32_0 = arith.constant 0 : i32
    %c0_i32_1 = arith.constant 0 : i32
    %c0_i32_2 = arith.constant 0 : i32
    return %c0_i32, %arg0, %c0_i32_0, %c0_i32_1 : i32, i32, i32, i32
  }
}

</mosaic_0001>

<bundles_post_ra>
// kernel: tpu_custom_call.1
= control target key start
LH: loop header
LB: loop body
LE: loop exit
PB: predicated region body
PF: predicated region fallthrough
CT: control target
= control target key end

     0   :  { %s5169_s0 = inlined_call_operand.hbm [shape: f32[8,2,8,8], index: 0, kind: input, shape index: {}]   ;;  %s5170_s1 = inlined_call_operand.hbm [shape: f32[8,2,8,8], index: 1, kind: input, shape index: {}]   ;;  %s5171_s2 = inlined_call_operand.hbm [shape: f32[2,8,32], index: 2, kind: input, shape index: {}]   ;;  %s5172_s3 = inlined_call_operand.hbm [shape: f32[2,8,32], index: 3, kind: input, shape index: {}]   ;;  %s5173_s4 = inlined_call_operand.hbm [shape: f32[8,128], index: 4, kind: input, shape index: {}]   ;;  %s5174_s5 = inlined_call_operand.vmem [shape: f32[8,128], index: 5, kind: input, shape index: {}]   ;;  %s5175_s6 = inlined_call_operand.vmem [shape: f32[1,128], index: 6, kind: input, shape index: {}]   ;;  %s5176_s7 = inlined_call_operand.hbm [shape: f32[32,128], index: 7, kind: input, shape index: {}]   ;;  %s5177_s8 = inlined_call_operand.hbm [shape: f32[128,128], index: 8, kind: input, shape index: {}]   ;;  %s5178_s9 = inlined_call_operand.hbm [shape: f32[8,2,8,32], index: 9, kind: output, shape index: {}]  }
   0x1   :  { %5201 = sst [smem:[#allocation27_spill]] %s5169_s0 }
   0x2   :  { %5202 = sst [smem:[#allocation28_spill]] %s5170_s1 }
   0x3   :  { %5203 = sst [smem:[#allocation29_spill]] %s5173_s4 }
   0x4   :  { %5204 = sst [smem:[#allocation30_spill]] %s5175_s6 }
   0x5   :  { %5205 = sst [smem:[#allocation31_spill]] %s5176_s7 }
   0x6   :  { %5206 = sst [smem:[#allocation32_spill]] %s5177_s8 }
   0x7   :  { %5207 = sst [smem:[#allocation33_spill]] %s5178_s9 }
   0x8   :  { %14 = vsyncpa [#allocation3], 0 }
   0x9   :  { %16 = vsyncpa [#allocation3 + $0x1], 0 }
   0xa   :  { %17 = vsyncpa [#allocation6], 0 }
   0xb   :  { %19 = vsyncpa [#allocation6 + $0x1], 0 }
   0xc   :  { %20 = vsyncpa [#allocation9], 0 }
   0xd   :  { %22 = vsyncpa [#allocation9 + $0x1], 0 }
   0xe   :  { %23 = vsyncpa [#allocation12], 0 }
   0xf   :  { %24 = vsyncpa [#allocation4], 0 }
  0x10   :  { %26 = vsyncpa [#allocation4 + $0x1], 0  ;;  %s4230_s30 = smov 0   ;;  %s4232_s10 = smov 0  }
  0x11   :  { %s4234_s11 = smov 0   ;;  %s4236_s12 = smov 0  }
  0x12 LB: > { %5208 = sst [smem:[#allocation21_spill]] %s4148_s30  ;;  %s4251_s13 = sadd.s32 4294967295, %s4160_s12   ;;  %s4160_s12 = sphi %s4236_s12, %s5251_s12   ;;  %s4156_s11 = sphi %s4234_s11, %s5253_s11   ;;  %s4152_s10 = sphi %s4232_s10, %s5255_s10   ;;  %s4148_s30 = sphi %s4230_s30, %s5254_s30  }
  0x13   : > { %5209 = sst [smem:[#allocation22_spill]] %s4156_s11  ;;  %s2983_s14 = sadd.s32 4294967294, %s4160_s12  }
  0x14   : > { %s4255_s15 = sadd.s32 1, %s4160_s12   ;;  %s39_s16 = sadd.s32 1, %s4156_s11 }
  0x15   : > { %5210 = sst [smem:[#allocation23_spill]] %s4255_s15  ;;  %s36_s17 = ssub.s32 %s4160_s12, %s4255_s15 }
  0x16   : > { %p46_p0 = scmp.ne.s32.totalorder %s4156_s11, %s4152_s10  ;;  %p37_p1 = scmp.eq.s32.totalorder %s36_s17, 0 }
  0x17   : > { %p47_p2 = scmp.eq.s32.totalorder %s4160_s12, 0  ;;  %p52_p3 = scmp.ne.s32.totalorder %s4152_s10, %s4148_s30 }
  0x18   : > { %p5179_p4 = scmp.eq.s32.totalorder %s4251_s13, 0  ;;  %p259_p7 = scmp.eq.s32.totalorder %s4251_s13, 1 }
  0x19   : > { %s4267_s18 = scalar_select %p37_p1, %s4156_s11, %s39_s16  }
  0x1a   : > { %p4269_p5 = por %p47_p2, %p46_p0  ;;  %p4275_p6 = por %p5179_p4, %p52_p3 }
  0x1b   : > { %5211 = sst [smem:[#allocation24_spill]] %s4267_s18  ;;  %p265_p8 = scmp.eq.s32.totalorder %s2983_s14, 1 }
  0x1c   : > { %s5213_s20 = scalar_select %p4275_p6, 1, 0 }
  0x1d   : > { %p2984_p9 = scmp.ge.s32.totalorder %s4160_s12, 1  ;;  %p272_p10 = scmp.lt.s32.totalorder %s4160_s12, 3 }
  0x1e   : > { %p4282_p11 = por %p259_p7, %p46_p0  ;;  %p4286_p12 = por %p265_p8, %p52_p3 }
  0x1f   : > { %p4290_p13 = pnand %p2984_p9, %p272_p10  ;;  %s4162_s24 = smov [#allocation10]  }
  0x20   : > { %s5214_s21 = scalar_select %p4282_p11, 1, 0 }
  0x21   : > { %s5216_s22 = scalar_select %p4286_p12, 1, 0 }
  0x22   : > { %5215 = sst [smem:[#allocation25_spill]] %s5214_s21  ;;  %p3726_p2 = pneg %p4290_p13 }
  0x23   : > { %5217 = sst [smem:[#allocation26_spill]] %s5216_s22  ;;  %s285_s25 = sshll.u32 %s4162_s24, 4  ;;  %s286_s25 = int_to_ptr.vmem [resolvable:$true] %s285_s25 }
  0x24   : > { %s5218_s23 = scalar_select %p4290_p13, 1, 0 }
  0x25   : > { %p3756_p4 = scmp.lt.s32.totalorder %s4160_s12, 2  ;;  %p5219_p0 = scmp.eq.s32.totalorder %s4251_s13, 0 }
  0x26   : > { %s4163_s28 = smov [#allocation11]   ;;  %s3901_s14 = scalar_lea.vmem %s286_s25, 128 }
  0x27   : > { %p4300_p7 = pnand %p3726_p2, %p5219_p0  ;;  %p4306_p3 = pnand %p3756_p4, %p4269_p5 }
  0x28   : > { %s301_s29 = sshll.u32 %s4163_s28, 4  ;;  %p3902_p9 = scmp.ne.s32.totalorder %s286_s25, %s3901_s14  ;;  %s302_s29 = int_to_ptr.vmem [resolvable:$true] %s301_s29 }
  0x29   : > { %s5220_s26 = scalar_select %p4300_p7, 1, 0 }
  0x2a   : > { %p5192_p8 = pneg %p4300_p7  ;;  %p3909_p0 = scmp.lt.s32.totalorder %s286_s25, %s286_s25 }
  0x2b   : > { %p3910_p1 = scmp.lt.s32.totalorder %s3901_s14, %s3901_s14 }
  0x2c   : > { %p3904_p10 = pnand %p3902_p9, %p5192_p8 }
  0x2d   : > { %p3911_p12 = por %p3910_p1, %p3909_p0 }
  0x2e   : > { %p3905_p2 = pneg %p3904_p10 }
  0x30   : > { %p3912_p11 = pnand %p3911_p12, %p3905_p2 }
  0x32   : > { %3915 = shalt.err (!%p3912_p11)
}
  0x33   : > { %s5222_s4 = sld [smem:[#allocation29_spill]]  ;;  %s4321_s19 = sand.u32 1, %s4156_s11  }
  0x34   : > { %s3927_s24 = scalar_lea.vmem %s302_s29, 512  ;;  %p3935_p10 = scmp.lt.s32.totalorder %s302_s29, %s302_s29 }
  0x35   : > { %p3928_p4 = scmp.ne.s32.totalorder %s302_s29, %s3927_s24  ;;  %p3936_p1 = scmp.lt.s32.totalorder %s3927_s24, %s3927_s24 }
  0x37   : > { %p3930_p5 = pnand %p3928_p4, %p5192_p8  ;;  %p3937_p12 = por %p3936_p1, %p3935_p10 }
  0x39   : > { %3729 = dma.hbm_to_vmem [thread:$0]  (!%p4300_p7), %s5222_s4, 128, %s286_s25, [#allocation9]  }
  0x3a   : > { %p3931_p9 = pneg %p3930_p5 }
  0x3c   : > { %p3938_p11 = pnand %p3937_p12, %p3931_p9 }
  0x3e   : > { %3941 = shalt.err (!%p3938_p11)
}
  0x3f   : > { %s5187_s28 = smov 128   ;;  %s5190_s25 = smov 8  }
  0x40   : > { %s5223_s7 = sld [smem:[#allocation31_spill]]  ;;  %s5186_s17 = sshll.u32 %s4321_s19, 6 }
  0x41   : > { %s4336_s24 = sshll.u32 %s4160_s12, 7  ;;  %s5189_s4 = sand.u32 1, %s4160_s12  }
  0x42   : > { %s5224_s1 = sld [smem:[#allocation28_spill]]  ;;  %s352_s22 = scalar_lea.vmem [#allocation5], %s5186_s17 }
  0x43   : > { %s358_s30 = sshll.u32 %s352_s22, 4  ;;  %p4357_p0 = pneg %p4306_p3  ;;  %s4347_s30 = int_to_ptr.vmem [resolvable:$true] %s358_s30 }
  0x46   : > { %3732 = dma.hbm_to_vmem [thread:$0]  (!%p4300_p7), %s5223_s7, 512, %s302_s29, [#allocation12], %s5187_s28, %s5187_s28, %s5190_s25  }
  0x47   : > { %s4351_s29 = scalar_lea.sflag [#allocation6], %s5189_s4 }
  0x48   : > { %s4343_s15 = scalar_lea.hbm %s5224_s1, %s4336_s24  ;;  %s3947_s22 = scalar_lea.hbm %s5224_s1, 2048 }
  0x49   : > { %s3942_s14 = scalar_lea.hbm %s4343_s15, 1024  ;;  %p3948_p9 = scmp.lt.s32.totalorder %s4343_s15, %s5224_s1 }
  0x4a   : > { %p3943_p2 = scmp.ne.s32.totalorder %s4343_s15, %s3942_s14  ;;  %p3949_p10 = scmp.lt.s32.totalorder %s3947_s22, %s3942_s14 }
  0x4c   : > { %p3945_p4 = pnand %p4357_p0, %p3943_p2  ;;  %p3950_p1 = por %p3949_p10, %p3948_p9 }
  0x4e   : > { %p3946_p5 = pneg %p3945_p4 }
  0x50   : > { %p3951_p12 = pnand %p3950_p1, %p3946_p5 }
  0x52   : > { %3954 = shalt.err (!%p3951_p12)
}
  0x53   : > { %s3955_s4 = scalar_lea.vmem %s4347_s30, 1024  ;;  %s4166_s25 = smov [#allocation5]  }
  0x54   : > { %p3956_p11 = scmp.ne.s32.totalorder %s4347_s30, %s3955_s4  ;;  %s3960_s11 = sshll.u32 %s4166_s25, 4  ;;  %s3961_s11 = int_to_ptr.vmem [resolvable:$false] %s3960_s11 }
  0x55   : > { %s3962_s18 = scalar_lea.vmem %s3961_s11, 2048  ;;  %p3963_p8 = scmp.lt.s32.totalorder %s4347_s30, %s3961_s11 }
  0x56   : > { %p3958_p2 = pnand %p3956_p11, %p4357_p0  ;;  %p3964_p6 = scmp.lt.s32.totalorder %s3962_s18, %s3955_s4 }
  0x58   : > { %p3959_p4 = pneg %p3958_p2  ;;  %p3965_p13 = por %p3964_p6, %p3963_p8 }
  0x5a   : > { %p3966_p7 = pnand %p3965_p13, %p3959_p4 }
  0x5c   : > { %3969 = shalt.err (!%p3966_p7)
}
  0x5d   : > { %s5197_s28 = smov 256   ;;  %s5226_s17 = smov 8  }
  0x5e   : > { %s5227_s14 = smov 128   ;;  %s4168_s22 = smov [#allocation13]  }
  0x5f   : > { %3742 = dma.hbm_to_vmem [thread:$0]  (!%p4306_p3), %s4343_s15, 1024, %s4347_s30, %s4351_s29, %s5197_s28, %s5227_s14, %s5226_s17  }
  0x60   : > { %s314_s25 = sshll.u32 %s4168_s22, 4  ;;  %p5228_p9 = scmp.ne.s32.totalorder %s5220_s26, 0  ;;  %s315_s25 = int_to_ptr.vmem [resolvable:$true] %s314_s25 }
  0x61   : > { %s3981_s1 = scalar_lea.vmem %s315_s25, 2048  ;;  %p3989_p8 = scmp.lt.s32.totalorder %s315_s25, %s315_s25 }
  0x62   : > { %p3982_p5 = scmp.ne.s32.totalorder %s315_s25, %s3981_s1  ;;  %p5229_p6 = pneg %p5228_p9 }
  0x63   : > { %p3990_p10 = scmp.lt.s32.totalorder %s3981_s1, %s3981_s1 }
  0x64   : > { %p3984_p13 = pnand %p3982_p5, %p5229_p6 }
  0x65   : > { %p3991_p1 = por %p3990_p10, %p3989_p8 }
  0x66   : > { %p3985_p7 = pneg %p3984_p13 }
  0x68   : > { %p3992_p12 = pnand %p3991_p1, %p3985_p7 }
  0x6a   : > { %3995 = shalt.err (!%p3992_p12)
}
  0x6b   : > { %s5230_s8 = sld [smem:[#allocation32_spill]]  ;;  %s5232_s18 = sshll.u32 %s4321_s19, 6 }
  0x6c   : > { %s5231_s0 = sld [smem:[#allocation27_spill]]  ;;  %s332_s26 = scalar_lea.vmem [#allocation2], %s5232_s18 }
  0x6d   : > { %s338_s22 = sshll.u32 %s332_s26, 4  ;;  %s2993_s4 = sshll.u32 %s4321_s19, 3  ;;  %s4402_s22 = int_to_ptr.vmem [resolvable:$true] %s338_s22 }
  0x6e   : > { %s329_s30 = scalar_lea.sflag [#allocation3], %s4321_s19 }
  0x71   : > { %3735 = dma.hbm_to_vmem [thread:$0]  (!%p5228_p9), %s5230_s8, 2048, %s315_s25, [#allocation12], %s5227_s14, %s5227_s14, %s5226_s17  }
  0x72   : > { %s4398_s1 = scalar_lea.hbm %s5231_s0, %s4336_s24  ;;  %s4001_s15 = scalar_lea.hbm %s5231_s0, 2048 }
  0x73   : > { %s3996_s28 = scalar_lea.hbm %s4398_s1, 1024  ;;  %p4002_p5 = scmp.lt.s32.totalorder %s4398_s1, %s5231_s0 }
  0x74   : > { %p3997_p11 = scmp.ne.s32.totalorder %s4398_s1, %s3996_s28  ;;  %p4003_p9 = scmp.lt.s32.totalorder %s4001_s15, %s3996_s28 }
  0x76   : > { %p3999_p2 = pnand %p3997_p11, %p4357_p0  ;;  %p4004_p6 = por %p4003_p9, %p4002_p5 }
  0x78   : > { %p4000_p4 = pneg %p3999_p2 }
  0x7a   : > { %p4005_p13 = pnand %p4004_p6, %p4000_p4 }
  0x7c   : > { %4008 = shalt.err (!%p4005_p13)
}
  0x7d   : > { %s4009_s18 = scalar_lea.vmem %s4402_s22, 1024  ;;  %s4169_s26 = smov [#allocation2]  }
  0x7e   : > { %p4010_p7 = scmp.ne.s32.totalorder %s4402_s22, %s4009_s18  ;;  %s4014_s7 = sshll.u32 %s4169_s26, 4  ;;  %s4015_s7 = int_to_ptr.vmem [resolvable:$false] %s4014_s7 }
  0x7f   : > { %s4016_s25 = scalar_lea.vmem %s4015_s7, 2048  ;;  %p4017_p1 = scmp.lt.s32.totalorder %s4402_s22, %s4015_s7 }
  0x80   : > { %p4012_p8 = pnand %p4010_p7, %p4357_p0  ;;  %p4018_p12 = scmp.lt.s32.totalorder %s4016_s25, %s4009_s18 }
  0x82   : > { %p4013_p10 = pneg %p4012_p8  ;;  %p4019_p11 = por %p4018_p12, %p4017_p1 }
  0x84   : > { %p4020_p2 = pnand %p4019_p11, %p4013_p10 }
  0x86   : > { %4023 = shalt.err (!%p4020_p2)
}
  0x87   : > { %s5233_s8 = smov 256   ;;  %s377_s11 = scalar_lea.hbm %s5171_s2, %s4336_s24 }
  0x88   : > { %3739 = dma.hbm_to_vmem [thread:$0]  (!%p4306_p3), %s4398_s1, 1024, %s4402_s22, %s329_s30, %s5233_s8, %s5227_s14, %s5226_s17  }
  0x89   : > { %s372_s18 = scalar_lea.vmem [#allocation7], %s2993_s4  ;;  %s4024_s7 = scalar_lea.hbm %s377_s11, 128 }
  0x8a   : > { %s379_s26 = sshll.u32 %s372_s18, 4  ;;  %p4025_p4 = scmp.ne.s32.totalorder %s377_s11, %s4024_s7  ;;  %s380_s26 = int_to_ptr.vmem [resolvable:$true] %s379_s26 }
  0x8b   : > { %s4029_s9 = scalar_lea.hbm %s5171_s2, 256  ;;  %p4030_p6 = scmp.lt.s32.totalorder %s377_s11, %s5171_s2 }
  0x8c   : > { %p4027_p5 = pnand %p4025_p4, %p4357_p0  ;;  %p4031_p13 = scmp.lt.s32.totalorder %s4029_s9, %s4024_s7 }
  0x8e   : > { %p4028_p9 = pneg %p4027_p5  ;;  %p4032_p7 = por %p4031_p13, %p4030_p6 }
  0x90   : > { %p4033_p8 = pnand %p4032_p7, %p4028_p9 }
  0x92   : > { %4036 = shalt.err (!%p4033_p8)
}
  0x93   : > { %s4037_s17 = scalar_lea.vmem %s380_s26, 128  ;;  %s4170_s14 = smov [#allocation7]  }
  0x94   : > { %p4038_p10 = scmp.ne.s32.totalorder %s380_s26, %s4037_s17  ;;  %s4042_s1 = sshll.u32 %s4170_s14, 4  ;;  %s4043_s1 = int_to_ptr.vmem [resolvable:$false] %s4042_s1 }
  0x95   : > { %s4044_s22 = scalar_lea.vmem %s4043_s1, 256  ;;  %p4045_p11 = scmp.lt.s32.totalorder %s380_s26, %s4043_s1 }
  0x96   : > { %p4040_p1 = pnand %p4038_p10, %p4357_p0  ;;  %p4046_p2 = scmp.lt.s32.totalorder %s4044_s22, %s4037_s17 }
  0x98   : > { %p4041_p12 = pneg %p4040_p1  ;;  %p4047_p4 = por %p4046_p2, %p4045_p11 }
  0x9a   : > { %p4048_p5 = pnand %p4047_p4, %p4041_p12 }
  0x9c   : > { %4051 = shalt.err (!%p4048_p5)
}
  0x9d   : > { %3745 = dma.hbm_to_vmem [thread:$0]  (!%p4306_p3), %s377_s11, 128, %s380_s26, %s4351_s29  }
  0x9e   : > { %s4452_s9 = scalar_lea.hbm %s5172_s3, %s4336_s24  ;;  %s390_s21 = scalar_lea.vmem [#allocation8], %s2993_s4 }
  0x9f   : > { %s397_s30 = sshll.u32 %s390_s21, 4  ;;  %s5234_s8 = sand.u32 1, %s4160_s12   ;;  %s398_s30 = int_to_ptr.vmem [resolvable:$true] %s397_s30 }
  0xa0   : > { %s387_s28 = scalar_lea.sflag [#allocation9], %s5234_s8  ;;  %s4052_s15 = scalar_lea.hbm %s4452_s9, 128 }
  0xa1   : > { %p4053_p9 = scmp.ne.s32.totalorder %s4452_s9, %s4052_s15  ;;  %s4057_s18 = scalar_lea.hbm %s5172_s3, 256 }
  0xa2   : > { %p4058_p7 = scmp.lt.s32.totalorder %s4452_s9, %s5172_s3  ;;  %p4059_p8 = scmp.lt.s32.totalorder %s4057_s18, %s4052_s15 }
  0xa3   : > { %p4055_p6 = pnand %p4053_p9, %p4357_p0 }
  0xa4   : > { %p4060_p10 = por %p4059_p8, %p4058_p7 }
  0xa5   : > { %p4056_p13 = pneg %p4055_p6 }
  0xa7   : > { %p4061_p1 = pnand %p4060_p10, %p4056_p13 }
  0xa9   : > { %4064 = shalt.err (!%p4061_p1)
}
  0xaa   : > { %s4065_s19 = scalar_lea.vmem %s398_s30, 128  ;;  %s4171_s4 = smov [#allocation8]  }
  0xab   : > { %p4066_p12 = scmp.ne.s32.totalorder %s398_s30, %s4065_s19  ;;  %s4070_s7 = sshll.u32 %s4171_s4, 4  ;;  %s4071_s7 = int_to_ptr.vmem [resolvable:$false] %s4070_s7 }
  0xac   : > { %s4072_s25 = scalar_lea.vmem %s4071_s7, 256  ;;  %p4073_p4 = scmp.lt.s32.totalorder %s398_s30, %s4071_s7 }
  0xad   : > { %p4068_p11 = pnand %p4066_p12, %p4357_p0  ;;  %p4074_p5 = scmp.lt.s32.totalorder %s4072_s25, %s4065_s19 }
  0xaf   : > { %p4069_p2 = pneg %p4068_p11  ;;  %p4075_p9 = por %p4074_p5, %p4073_p4 }
  0xb1   : > { %p4076_p6 = pnand %p4075_p9, %p4069_p2 }
  0xb3   : > { %4079 = shalt.err (!%p4076_p6)
}
  0xb4   : > { %3748 = dma.hbm_to_vmem [thread:$0]  (!%p4306_p3), %s4452_s9, 128, %s398_s30, %s387_s28  }
  0xb5   : > { %p5235_p13 = scmp.ne.s32.totalorder %s5218_s23, 0 }
  0xb6   : > { %s4477_s16 = sand.u32 (!%p5235_p13), 1, %s4152_s10   ;;  %p5236_p0 = scmp.ne.s32.totalorder (!%p5235_p13), %s5213_s20, 0 }
  0xb7   : > { %406 = sbr.rel (%p5235_p13) target bundleno = 6724 (0x1a44), region = 56  ;;  %s4480_s17 = sshll.u32 (!%p5235_p13), %s4477_s16, 6 }
  0xb8   : > { %s409_s14 = scalar_lea.sflag (!%p5235_p13), [#allocation3], %s4477_s16  ;;  %s4484_s1 = scalar_lea.vmem (!%p5235_p13), [#allocation2], %s4480_s17 }
  0xbc   : > { %4123 = dma.done.wait (%p5236_p0), %s409_s14, 1024  }
  0xbd   : > { %4125 = vsyncadd (%p5236_p0), %s409_s14, 4294966272  ;;  %s417_s23 = sand.u32 1, %s4251_s13   ;;  %s4492_s22 = scalar_lea.vmem [#allocation5], %s4480_s17 }
  0xbe   : > { %s418_s27 = scalar_lea.sflag [#allocation6], %s417_s23 }
  0xbf   : > { %4127 = dma.done.wait (%p5236_p0), %s418_s27, 1152  }
  0xc0   : > { %4129 = vsyncadd (%p5236_p0), %s418_s27, 4294966144  ;;  %s3000_s0 = sshll.u32 %s4477_s16, 3  ;;  %s436_s9 = scalar_lea.sflag [#allocation9], %s417_s23 }
  0xc1   : > { %s4499_s6 = scalar_lea.vmem [#allocation7], %s3000_s0  ;;  %s4501_s21 = scalar_lea.vmem [#allocation8], %s3000_s0 }
  0xc2   : > { %4131 = dma.done.wait (%p5236_p0), %s436_s9, 128  }
  0xc3   : > { %4133 = vsyncadd (%p5236_p0), %s436_s9, 4294967168  ;;  %p5237_p3 = scmp.eq.s32.totalorder %s4251_s13, 0 }
  0xc5   : > { %4135 = dma.done.wait (%p5237_p3), [#allocation9], 128   ;;  %p5238_p7 = pmov %p5237_p3 }
  0xc6   : > { %p5239_p8 = pmov %p5237_p3 }
  0xc7   : > { %4137 = vsyncadd (%p5238_p7), [#allocation9], 4294967168 }
  0xc8   : > { %4139 = dma.done.wait (%p5239_p8), [#allocation12], 2560   ;;  %p5240_p10 = pmov %p5237_p3 }
  0xc9   : > { %v4172_v0 = vmov 0.0   ;;  %vm4173_vm0 = vmmov 0   ;;  %vm517_vm1 = vcmask 64512   ;;  %v4522_v1 = vld [vmem:[%s4484_s1] sm:$0xff]  ;;  %v4525_v2 = vld [vmem:[%s4484_s1 + $0x8] sm:$0xff]  ;;  %v4532_v5 = vld [vmem:[%s4484_s1 + $0x10] sm:$0xff] }
  0xca   : > { %4141 = vsyncadd (%p5240_p10), [#allocation12], 4294964736  ;;  %3268 = vmatprep.subr.mxu0 %v4172_v0  ;;  %3273 = vmatprep.subr.mxu1 %v4172_v0  ;;  %v509_v3 = vld [vmem:[%s4492_s22] sm:$0xff]  ;;  %v510_v4 = vld [vmem:[%s4492_s22 + $0x8] sm:$0xff]  ;;  %vm1404_vm2 = vcmask 261120   ;;  %s5241_s15 = sld [smem:[#allocation30_spill]] }
  0xcb   : > { %3270 = vmatprep.mubr.msk.f32.mxu0 %vm4173_vm0, %v4172_v0  ;;  %3275 = vmatprep.mubr.msk.f32.mxu1 %vm4173_vm0, %v4172_v0  ;;  %v4535_v6 = vld [vmem:[%s4484_s1 + $0x18] sm:$0xff]  ;;  %v511_v7 = vld [vmem:[%s4492_s22 + $0x10] sm:$0xff]  ;;  %v4550_v9 = vld [vmem:[%s4484_s1 + $0x20] sm:$0xff]  ;;  %s4174_s29 = smov 64   ;;  %s4175_s11 = smov 32  }
  0xcc   : > { %3269 = vmatpush3.msra.mxu0 %v4522_v1  ;;  %3274 = vmatpush3.msra.mxu1 %v4525_v2  ;;  %v512_v8 = vld [vmem:[%s4492_s22 + $0x18] sm:$0xff]  ;;  %v4553_v10 = vld [vmem:[%s4484_s1 + $0x28] sm:$0xff]  ;;  %v513_v11 = vld [vmem:[%s4492_s22 + $0x20] sm:$0xff]  ;;  %s4758_s18 = scalar_lea.vmem [#allocation14], %s4480_s17  ;;  %s5244_s24 = sld [smem:[#allocation25_spill]] }
  0xcd   : > { %3271 = vmatmul.mubr.msk.f32.vlgmr.msra.gmra.mxu0 %vm517_vm1, %v509_v3  ;;  %3276 = vmatmul.mubr.msk.f32.vlgmr.msra.gmra.mxu1 %vm517_vm1, %v510_v4  ;;  %v514_v12 = vld [vmem:[%s4492_s22 + $0x28] sm:$0xff]  ;;  %v4568_v13 = vld [vmem:[%s4484_s1 + $0x30] sm:$0xff]  ;;  %v4571_v14 = vld [vmem:[%s4484_s1 + $0x38] sm:$0xff]  ;;  %s2816_s26 = sshll.u32 %s4758_s18, 4  ;;  %s3055_s19 = sshll.u32 %s4251_s13, 7  ;;  %s5119_s26 = int_to_ptr.vmem [resolvable:$true] %s2816_s26 }
  0xce   : > { %3278 = vmatprep.subr.mxu0 %v4172_v0  ;;  %3283 = vmatprep.subr.mxu1 %v4172_v0  ;;  %v515_v15 = vld [vmem:[%s4492_s22 + $0x30] sm:$0xff]  ;;  %v516_v16 = vld [vmem:[%s4492_s22 + $0x38] sm:$0xff]  ;;  %v1103_v17 = vld [vmem:[%s5174_s5] sm:$0xff]  ;;  %s5245_s25 = sld [smem:[#allocation33_spill]]  ;;  %s2804_s14 = scalar_lea.sflag [#allocation4], %s4477_s16 }
  0xcf   : > { %3279 = vmatpush3.msra.mxu0 %v4532_v5  ;;  %3284 = vmatpush3.msra.mxu1 %v4535_v6  ;;  %v1102_v18 = vld [vmem:[#allocation10] sm:$0xff]  ;;  %v4597_v20 = vld [vmem:[#allocation11 + $0x10] sm:$0xff]  ;;  %v4601_v21 = vld [vmem:[#allocation11 + $0x8] sm:$0xff]  ;;  %s4080_s1 = scalar_lea.vmem %s5119_s26, 1024  ;;  %s4176_s13 = smov [#allocation14]  }
  0xd0   : > { %3280 = vmatprep.mubr.msk.f32.mxu0 %vm4173_vm0, %v4172_v0  ;;  %3285 = vmatprep.mubr.msk.f32.mxu1 %vm4173_vm0, %v4172_v0  ;;  %v4593_v19 = vld [vmem:[#allocation11 + $0x18] sm:$0xff]  ;;  %v4605_v22 = vld [vmem:[#allocation11] sm:$0xff]  ;;  %v4654_v43 = vld [vmem:[#allocation13 + $0x70] sm:$0xff]  ;;  %p4081_p1 = scmp.ne.s32.totalorder %s5119_s26, %s4080_s1  ;;  %s4084_s23 = sshll.u32 %s4176_s13, 4  ;;  %s4085_s23 = int_to_ptr.vmem [resolvable:$false] %s4084_s23 }
  0xd1   : > { %3281 = vmatmul.mubr.msk.f32.vlgmr.msra.gmra.mxu0 %vm517_vm1, %v511_v7  ;;  %3286 = vmatmul.mubr.msk.f32.vlgmr.msra.gmra.mxu1 %vm517_vm1, %v512_v8  ;;  %v1402_v23 = vld [vmem:[%s4499_s6] sm:$0xff]  ;;  %v4658_v44 = vld [vmem:[#allocation13 + $0x68] sm:$0xff]  ;;  %v4670_v47 = vld [vmem:[#allocation13 + $0x50] sm:$0xff]  ;;  %s4086_s27 = scalar_lea.vmem %s4085_s23, 2048  ;;  %p4087_p4 = scmp.lt.s32.totalorder %s5119_s26, %s4085_s23 }
  0xd2   : > { %3288 = vmatprep.subr.mxu0 %v4172_v0  ;;  %3293 = vmatprep.subr.mxu1 %v4172_v0  ;;  %v4650_v42 = vld [vmem:[#allocation13 + $0x78] sm:$0xff]  ;;  %v4662_v45 = vld [vmem:[#allocation13 + $0x60] sm:$0xff]  ;;  %v4674_v48 = vld [vmem:[#allocation13 + $0x48] sm:$0xff]  ;;  %p5246_p12 = scmp.ne.s32.totalorder %s5244_s24, 0  ;;  %p4088_p5 = scmp.lt.s32.totalorder %s4086_s27, %s4080_s1 }
  0xd3   : > { %3289 = vmatpush3.msra.mxu0 %v4550_v9  ;;  %3294 = vmatpush3.msra.mxu1 %v4553_v10  ;;  %v4666_v46 = vld [vmem:[#allocation13 + $0x58] sm:$0xff]  ;;  %v4678_v49 = vld [vmem:[#allocation13 + $0x40] sm:$0xff]  ;;  %v4685_v51 = vld [vmem:[#allocation13 + $0x30] sm:$0xff] }
  0xd4   : > { %3290 = vmatprep.mubr.msk.f32.mxu0 %vm4173_vm0, %v4172_v0  ;;  %3295 = vmatprep.mubr.msk.f32.mxu1 %vm4173_vm0, %v4172_v0  ;;  %v4682_v50 = vld [vmem:[#allocation13 + $0x38] sm:$0xff]  ;;  %v4688_v52 = vld [vmem:[#allocation13 + $0x28] sm:$0xff]  ;;  %v4692_v53 = vld [vmem:[#allocation13 + $0x20] sm:$0xff]  ;;  %s5124_s17 = scalar_lea.hbm %s5245_s25, %s3055_s19  ;;  %p4082_p11 = pnand %p4081_p1, %p5246_p12 }
  0xd5   : > { %3291 = vmatmul.mubr.msk.f32.vlgmr.msra.gmra.mxu0 %vm517_vm1, %v513_v11  ;;  %3296 = vmatmul.mubr.msk.f32.vlgmr.msra.gmra.mxu1 %vm517_vm1, %v514_v12  ;;  %v4696_v54 = vld [vmem:[#allocation13 + $0x18] sm:$0xff]  ;;  %v4700_v55 = vld [vmem:[#allocation13 + $0x10] sm:$0xff]  ;;  %v4704_v56 = vld [vmem:[#allocation13 + $0x8] sm:$0xff]  ;;  %p4089_p9 = por %p4088_p5, %p4087_p4 }
  0xd6   : > { %3298 = vmatprep.subr.mxu0 %v4172_v0  ;;  %3303 = vmatprep.subr.mxu1 %v4172_v0  ;;  %v4708_v57 = vld [vmem:[#allocation13] sm:$0xff]  ;;  %v3030_v4 = vld [vmem:[%s5241_s15] ss:$0 sm:$0xff]  ;;  %p4083_p2 = pneg %p4082_p11 }
  0xd7   : > { %3299 = vmatpush3.msra.mxu0 %v4568_v13  ;;  %3304 = vmatpush3.msra.mxu1 %v4571_v14 }
  0xd8   : > { %3300 = vmatprep.mubr.msk.f32.mxu0 %vm4173_vm0, %v4172_v0  ;;  %3305 = vmatprep.mubr.msk.f32.mxu1 %vm4173_vm0, %v4172_v0  ;;  %p4090_p6 = pnand %p4089_p9, %p4083_p2 }
  0xd9   : > { %3301 = vmatmul.mubr.msk.f32.vlgmr.msra.gmra.mxu0 %vm517_vm1, %v515_v15  ;;  %3306 = vmatmul.mubr.msk.f32.vlgmr.msra.gmra.mxu1 %vm517_vm1, %v516_v16 }
  0xda   : > { %3308 = vmatprep.subr.mxu1 %v1103_v17  ;;  %3336 = vmatprep.subr.mxu0 %v4172_v0 }
  0xdb   : > { %3309 = vmatpush3.msra.mxu1 %v1103_v17  ;;  %3344 = vmatprep.mubr.msk.f32.mxu0 %vm4173_vm0, %v4172_v0 }
  0xdc   : > { %3322 = vmatprep.subr.mxu1 %v1102_v18  ;;  %3337 = vmatpush3.msra.mxu0 %v4593_v19 }
  0xdd   : > { %3338 = vmatprep.subr.mxu0 %v4172_v0 }
  0xde   : > { %3339 = vmatpush3.msra.mxu0 %v4597_v20 }
  0xdf   : > { %3340 = vmatprep.subr.mxu0 %v4172_v0 }
  0xe0   : > { %3341 = vmatpush3.msra.mxu0 %v4601_v21 }
  0xe1   : > { %3342 = vmatprep.subr.mxu0 %v4172_v0 }
  0xe2   : > { %3343 = vmatpush3.msra.mxu0 %v4605_v22 }
  0xe3   : > { %3345 = vmatmul.mubr.msk.f32.vlgmr.msra.gmra.mxu0 %vm1404_vm2, %v1402_v23  ;;  %3382 = vmatprep.subr.mxu0 %v4172_v0 }
  0xe4   : > { %3383 = vmatpush3.msra.mxu0 %v4593_v19  ;;  %3390 = vmatprep.mubr.msk.f32.mxu0 %vm4173_vm0, %v4172_v0 }
  0xe5   : > { %3384 = vmatprep.subr.mxu0 %v4172_v0 }
  0xe6   : > { %3385 = vmatpush3.msra.mxu0 %v4597_v20 }
  0xe7   : > { %3386 = vmatprep.subr.mxu0 %v4172_v0 }
  0xe8   : > { %3387 = vmatpush3.msra.mxu0 %v4601_v21 }
  0xe9   : > { %3388 = vmatprep.subr.mxu0 %v4172_v0 }
  0xea   : > { %3389 = vmatpush3.msra.mxu0 %v4605_v22 }
  0xeb   : > { %3393 = vmatprep.subr.mxu0 %v4172_v0 }
 0x18d   : > { %v587_v24 = vpop.f32.mrf.mxu0  ;;  %v660_v25 = vpop.f32.mrf.mxu1 }
 0x18e   : > { %3310 = vmatprep.mubr.msk.f32.mxu1 %vm517_vm1, %v587_v24 }
 0x18f   : > { %v3272_v26 = vpop.f32.mrf.mxu0  ;;  %v3277_v27 = vpop.f32.mrf.mxu1  ;;  %3311 = vmatmul.mubr.msk.f32.vlgmr.msra.gmra.mxu1 %vm517_vm1, %v660_v25 }
 0x190   : > { %3323 = vmatpush3.msra.mxu1 %v1102_v18 }
 0x191   : > { %v733_v28 = vpop.f32.mrf.mxu0  ;;  %v806_v29 = vpop.f32.mrf.mxu1  ;;  %3347 = vmatprep.subr.mxu1 %v4172_v0 }
 0x192   : > { %3313 = vmatprep.mubr.msk.f32.mxu1 %vm517_vm1, %v733_v28 }
 0x193   : > { %v3282_v30 = vpop.f32.mrf.mxu0  ;;  %v3287_v31 = vpop.f32.mrf.mxu1  ;;  %3314 = vmatmul.mubr.msk.f32.gmra.mxu1 %vm517_vm1, %v806_v29 }
 0x195   : > { %v879_v32 = vpop.f32.mrf.mxu0  ;;  %v952_v33 = vpop.f32.mrf.mxu1 }
 0x196   : > { %3316 = vmatprep.mubr.msk.f32.mxu1 %vm517_vm1, %v879_v32 }
 0x197   : > { %v3292_v34 = vpop.f32.mrf.mxu0  ;;  %v3297_v35 = vpop.f32.mrf.mxu1  ;;  %3317 = vmatmul.mubr.msk.f32.gmra.mxu1 %vm517_vm1, %v952_v33 }
 0x199   : > { %v1025_v36 = vpop.f32.mrf.mxu0  ;;  %v1098_v37 = vpop.f32.mrf.mxu1 }
 0x19a   : > { %3319 = vmatprep.mubr.msk.f32.mxu1 %vm517_vm1, %v1025_v36  ;;  %v1397_v36 = vlaneseq }
 0x19b   : > { %v3302_v38 = vpop.f32.mrf.mxu0  ;;  %v3307_v39 = vpop.f32.mrf.mxu1  ;;  %3320 = vmatmul.mubr.msk.f32.gmra.mxu1 %vm517_vm1, %v1098_v37 }
 0x19c   : > { %3324 = vmatprep.mubr.msk.f32.mxu1 %vm517_vm1, %v4522_v1  ;;  %v1398_v37 = vand.u32 127, %v1397_v36 }
 0x19e   : > { %vm1399_vm3 = vcmp.ge.s32.totalorder %v1398_v37, 64  ;;  %vm1400_vm4 = vcmp.lt.s32.totalorder %v1398_v37, 96 }
 0x19f   : > { %3325 = vmatmul.mubr.msk.f32.vlgmr.msra.gmra.mxu1 %vm517_vm1, %v4525_v2  ;;  %vm4732_vm5 = vmand %vm1399_vm3, %vm1400_vm4 }
 0x1a0   : > { %3327 = vmatprep.mubr.msk.f32.mxu1 %vm517_vm1, %v4532_v5  ;;  %3348 = vmatpush3.msra.mxu1 %v4650_v42 }
 0x1a1   : > { %3349 = vmatprep.subr.mxu1 %v4172_v0 }
 0x1a2   : > { %3350 = vmatpush3.msra.mxu1 %v4654_v43 }
 0x1a3   : > { %3328 = vmatmul.mubr.msk.f32.gmra.mxu1 %vm517_vm1, %v4535_v6  ;;  %v4648_v40 = vpop.f32.mrf.mxu0  ;;  %3351 = vmatprep.subr.mxu1 %v4172_v0 }
 0x1a4   : > { %3330 = vmatprep.mubr.msk.f32.mxu1 %vm517_vm1, %v4550_v9  ;;  %3352 = vmatpush3.msra.mxu1 %v4658_v44 }
 0x1a5   : > { %v3346_v41 = vpop.f32.mrf.mxu0  ;;  %3353 = vmatprep.subr.mxu1 %v4172_v0 }
 0x1a6   : > { %3354 = vmatpush3.msra.mxu1 %v4662_v45 }
 0x1a7   : > { %3331 = vmatmul.mubr.msk.f32.gmra.mxu1 %vm517_vm1, %v4553_v10  ;;  %3355 = vmatprep.subr.mxu1 %v4172_v0 }
 0x1a8   : > { %3333 = vmatprep.mubr.msk.f32.mxu1 %vm517_vm1, %v4568_v13  ;;  %3356 = vmatpush3.msra.mxu1 %v4666_v46 }
 0x1a9   : > { %3357 = vmatprep.subr.mxu1 %v4172_v0 }
 0x1aa   : > { %3358 = vmatpush3.msra.mxu1 %v4670_v47 }
 0x1ab   : > { %3334 = vmatmul.mubr.msk.f32.gmra.mxu1 %vm517_vm1, %v4571_v14  ;;  %3359 = vmatprep.subr.mxu1 %v4172_v0 }
 0x1ac   : > { %3379 = vmatprep.mubr.msk.f32.mxu1 %vm4173_vm0, %v4172_v0  ;;  %3360 = vmatpush3.msra.mxu1 %v4674_v48 }
 0x1ad   : > { %3361 = vmatprep.subr.mxu1 %v4172_v0 }
 0x1ae   : > { %3362 = vmatpush3.msra.mxu1 %v4678_v49 }
 0x1af   : > { %3363 = vmatprep.subr.mxu1 %v4172_v0 }
 0x1b0   : > { %3364 = vmatpush3.msra.mxu1 %v4682_v50 }
 0x1b1   : > { %3365 = vmatprep.subr.mxu1 %v4172_v0 }
 0x1b2   : > { %3366 = vmatpush3.msra.mxu1 %v4685_v51 }
 0x1b3   : > { %3367 = vmatprep.subr.mxu1 %v4172_v0 }
 0x1b4   : > { %3368 = vmatpush3.msra.mxu1 %v4688_v52 }
 0x1b5   : > { %3369 = vmatprep.subr.mxu1 %v4172_v0 }
 0x1b6   : > { %3370 = vmatpush3.msra.mxu1 %v4692_v53 }
 0x1b7   : > { %3371 = vmatprep.subr.mxu1 %v4172_v0 }
 0x1b8   : > { %3372 = vmatpush3.msra.mxu1 %v4696_v54 }
 0x1b9   : > { %3373 = vmatprep.subr.mxu1 %v4172_v0 }
 0x1ba   : > { %3374 = vmatpush3.msra.mxu1 %v4700_v55 }
 0x1bb   : > { %3375 = vmatprep.subr.mxu1 %v4172_v0 }
 0x1bc   : > { %3376 = vmatpush3.msra.mxu1 %v4704_v56 }
 0x1bd   : > { %3377 = vmatprep.subr.mxu1 %v4172_v0 }
 0x1be   : > { %3378 = vmatpush3.msra.mxu1 %v4708_v57 }
 0x1bf   : > { %3428 = vmatprep.subr.mxu1 %v4172_v0 }
 0x24f   : > { %v3312_v58 = vpop.f32.mrf.mxu1 }
 0x251   : > { %v1194_v59 = vpop.f32.mrf.mxu1 }
 0x253   : > { %v3315_v60 = vpop.f32.mrf.mxu1 }
 0x255   : > { %v1204_v61 = vpop.f32.mrf.mxu1 }
 0x257   : > { %v3318_v62 = vpop.f32.mrf.mxu1 }
 0x259   : > { %v1214_v63 = vpop.f32.mrf.mxu1 }
 0x25b   : > { %v3321_v1 = vpop.f32.mrf.mxu1 }
 0x25d   : > { %v1224_v2 = vpop.f32.mrf.mxu1 }
 0x25f   : > { %v3326_v3 = vpop.f32.mrf.mxu1 }
 0x260   : > { %v1329_v5 = vadd.f32 %v3326_v3, %v3312_v58  ;;  %v1403_v58 = vld [vmem:[%s4501_s21] sm:$0xff] }
 0x261   : > { %v1323_v6 = vpop.f32.mrf.mxu1 }
 0x262   : > { %v1324_v7 = vadd.f32 %v1323_v6, %v1194_v59  ;;  %v4717_v8 = vadd.f32 %v3030_v4, %v1329_v5 }
 0x263   : > { %v3329_v9 = vpop.f32.mrf.mxu1 }
 0x264   : > { %v1339_v10 = vadd.f32 %v3329_v9, %v3315_v60  ;;  %v1369_v11 = vadd.f32 %v3030_v4, %v1324_v7 }
 0x265   : > { %v1333_v12 = vpop.f32.mrf.mxu1 }
 0x266   : > { %v1478_v13 = vadd.f32 %v4648_v40, %v1369_v11  ;;  %v1334_v14 = vadd.f32 %v1333_v12, %v1204_v61  ;;  %v4720_v15 = vadd.f32 %v3030_v4, %v1339_v10 }
 0x267   : > { %v3332_v16 = vpop.f32.mrf.mxu1 }
 0x268   : > { %v3032_v17 = vmul.f32 -1.442695, %v1478_v13  ;;  %v1349_v18 = vadd.f32 %v3332_v16, %v3318_v62  ;;  %v4722_v23 = vadd.f32 %v3030_v4, %v1334_v14 }
 0x269   : > { %v1343_v24 = vpop.f32.mrf.mxu1 }
 0x26a   : > { %3806 = vpow2.f32 %v3032_v17  ;;  %v1344_v25 = vadd.f32 %v1343_v24, %v1214_v63  ;;  %v4724_v26 = vadd.f32 %v3030_v4, %v1349_v18 }
 0x26b   : > { %v3335_v27 = vpop.f32.mrf.mxu1  ;;  %3808 = vtanh.f32 %v1478_v13 }
 0x26c   : > { %v1359_v28 = vadd.f32 %v3335_v27, %v3321_v1  ;;  %v4726_v29 = vadd.f32 %v3030_v4, %v1344_v25 }
 0x26d   : > { %v1353_v30 = vpop.f32.mrf.mxu1 }
 0x26e   : > { %v1354_v31 = vadd.f32 %v1353_v30, %v1224_v2  ;;  %v4728_v32 = vadd.f32 %v3030_v4, %v1359_v28 }
 0x270   : > { %v4730_v33 = vadd.f32 %v3030_v4, %v1354_v31 }
 0x277   : > { %v3807_v34 = vpop.eup %3806 }
 0x278   : > { %v1483_v35 = vadd.f32 1.0, %v3807_v34  ;;  %v3809_v39 = vpop.eup %3808 }
 0x27a   : > { %3810 = vrcp.f32 %v1483_v35 }
 0x287   : > { %v3811_v40 = vpop.eup %3810 }
 0x288   : > { %v1488_v41 = vsel %vm4732_vm5, %v3809_v39, %v3811_v40 }
 0x289   : > { %1565 = vrot.lane.b32.xlu0 %v1488_v41, %s4174_s29  ;;  %3380 = vmatmul.mubr.f32.vlgmr.msra.gmra.mxu1 %v1488_v41 }
 0x28a   : > { %3429 = vmatpush3.msra.mxu1 %v4593_v19  ;;  %3436 = vmatprep.mubr.msk.f32.mxu1 %vm4173_vm0, %v4172_v0 }
 0x28b   : > { %3430 = vmatprep.subr.mxu1 %v4172_v0 }
 0x28c   : > { %3431 = vmatpush3.msra.mxu1 %v4597_v20 }
 0x28d   : > { %1560 = vrot.lane.b32.xlu0 %v1403_v58, %s4175_s11  ;;  %3432 = vmatprep.subr.mxu1 %v4172_v0 }
 0x28e   : > { %3433 = vmatpush3.msra.mxu1 %v4601_v21 }
 0x28f   : > { %3434 = vmatprep.subr.mxu1 %v4172_v0 }
 0x290   : > { %3435 = vmatpush3.msra.mxu1 %v4605_v22 }
 0x291   : > { %3439 = vmatprep.subr.mxu1 %v4172_v0 }
 0x2fb   : > { %v1566_v59 = vpop.permute.xlu0 %1565 }
 0x2ff   : > { %v1561_v63 = vpop.permute.xlu0 %1560 }
 0x349   : > { %v1555_v60 = vpop.f32.mrf.mxu1 }
 0x34a   : > { %v1568_v61 = vmul.f32 %v1566_v59, %v1555_v60  ;;  %v1563_v1 = vmul.f32 %v1561_v63, %v1555_v60 }
 0x34b   : > { %v3381_v62 = vpop.f32.mrf.mxu1 }
 0x34c   : > { %1570 = vrot.lane.b32.xlu1 %v1568_v61, %s4175_s11 }
 0x3be   : > { %v1571_v2 = vpop.permute.xlu1 %1570 }
 0x3bf   : > { %v4752_v3 = vadd.f32 %v1571_v2, %v1563_v1 }
 0x3c1   : > { %3812 = vtanh.f32 %v4752_v3 }
 0x3ce   : > { %v3813_v4 = vpop.eup %3812 }
 0x3cf   : > { %1576 = vrot.lane.b32.xlu1 %v3813_v4, %s4174_s29 }
 0x441   : > { %v1577_v5 = vpop.permute.xlu1 %1576 }
 0x442   : > { %v1579_v6 = vmul.f32 %v1577_v5, %v1555_v60 }
 0x444   : > { %1581 = vrot.lane.b32.xlu0 %v1579_v6, %s4175_s11 }
 0x4b6   : > { %v1582_v7 = vpop.permute.xlu0 %1581 }
 0x4b7   : > { %1584 = vst.msk [vmem:[%s4758_s18] sm:$0xff] %vm1404_vm2, %v1582_v7  ;;  %3391 = vmatmul.mubr.msk.f32.vlgmr.msra.gmra.mxu0 %vm1404_vm2, %v1582_v7 }
 0x4b8   : > { %3394 = vmatpush3.msra.mxu0 %v4650_v42  ;;  %3425 = vmatprep.mubr.msk.f32.mxu0 %vm4173_vm0, %v4172_v0 }
 0x4b9   : > { %3395 = vmatprep.subr.mxu0 %v4172_v0 }
 0x4ba   : > { %3396 = vmatpush3.msra.mxu0 %v4654_v43 }
 0x4bb   : > { %3397 = vmatprep.subr.mxu0 %v4172_v0 }
 0x4bc   : > { %3398 = vmatpush3.msra.mxu0 %v4658_v44 }
 0x4bd   : > { %3399 = vmatprep.subr.mxu0 %v4172_v0 }
 0x4be   : > { %3400 = vmatpush3.msra.mxu0 %v4662_v45 }
 0x4bf   : > { %3401 = vmatprep.subr.mxu0 %v4172_v0 }
 0x4c0   : > { %3402 = vmatpush3.msra.mxu0 %v4666_v46 }
 0x4c1   : > { %3403 = vmatprep.subr.mxu0 %v4172_v0 }
 0x4c2   : > { %3404 = vmatpush3.msra.mxu0 %v4670_v47 }
 0x4c3   : > { %3405 = vmatprep.subr.mxu0 %v4172_v0 }
 0x4c4   : > { %3406 = vmatpush3.msra.mxu0 %v4674_v48 }
 0x4c5   : > { %3407 = vmatprep.subr.mxu0 %v4172_v0 }
 0x4c6   : > { %3408 = vmatpush3.msra.mxu0 %v4678_v49 }
 0x4c7   : > { %3409 = vmatprep.subr.mxu0 %v4172_v0 }
 0x4c8   : > { %3410 = vmatpush3.msra.mxu0 %v4682_v50 }
 0x4c9   : > { %3411 = vmatprep.subr.mxu0 %v4172_v0 }
 0x4ca   : > { %3412 = vmatpush3.msra.mxu0 %v4685_v51 }
 0x4cb   : > { %3413 = vmatprep.subr.mxu0 %v4172_v0 }
 0x4cc   : > { %3414 = vmatpush3.msra.mxu0 %v4688_v52 }
 0x4cd   : > { %3415 = vmatprep.subr.mxu0 %v4172_v0 }
 0x4ce   : > { %3416 = vmatpush3.msra.mxu0 %v4692_v53 }
 0x4cf   : > { %3417 = vmatprep.subr.mxu0 %v4172_v0 }
 0x4d0   : > { %3418 = vmatpush3.msra.mxu0 %v4696_v54 }
 0x4d1   : > { %3419 = vmatprep.subr.mxu0 %v4172_v0 }
 0x4d2   : > { %3420 = vmatpush3.msra.mxu0 %v4700_v55 }
 0x4d3   : > { %3421 = vmatprep.subr.mxu0 %v4172_v0 }
 0x4d4   : > { %3422 = vmatpush3.msra.mxu0 %v4704_v56 }
 0x4d5   : > { %3423 = vmatprep.subr.mxu0 %v4172_v0 }
 0x4d6   : > { %3424 = vmatpush3.msra.mxu0 %v4708_v57 }
 0x4d7   : > { %3474 = vmatprep.subr.mxu0 %v4172_v0 }
 0x577   : > { %v1653_v9 = vpop.f32.mrf.mxu0 }
 0x578   : > { %v1657_v10 = vadd.f32 %v1653_v9, %v4717_v8 }
 0x579   : > { %v3392_v11 = vpop.f32.mrf.mxu0 }
 0x57a   : > { %v3034_v12 = vmul.f32 -1.442695, %v1657_v10 }
 0x57c   : > { %3814 = vpow2.f32 %v3034_v12 }
 0x57d   : > { %3816 = vtanh.f32 %v1657_v10 }
 0x589   : > { %v3815_v13 = vpop.eup %3814 }
 0x58a   : > { %v1662_v14 = vadd.f32 1.0, %v3815_v13  ;;  %v3817_v16 = vpop.eup %3816 }
 0x58c   : > { %3818 = vrcp.f32 %v1662_v14 }
 0x599   : > { %v3819_v17 = vpop.eup %3818 }
 0x59a   : > { %v1665_v18 = vsel %vm4732_vm5, %v3817_v16, %v3819_v17 }
 0x59b   : > { %1738 = vrot.lane.b32.xlu1 %v1665_v18, %s4174_s29  ;;  %3426 = vmatmul.mubr.f32.vlgmr.msra.gmra.mxu0 %v1665_v18 }
 0x59c   : > { %3475 = vmatpush3.msra.mxu0 %v4593_v19  ;;  %3482 = vmatprep.mubr.msk.f32.mxu0 %vm4173_vm0, %v4172_v0 }
 0x59d   : > { %3476 = vmatprep.subr.mxu0 %v4172_v0 }
 0x59e   : > { %3477 = vmatpush3.msra.mxu0 %v4597_v20 }
 0x59f   : > { %3478 = vmatprep.subr.mxu0 %v4172_v0 }
 0x5a0   : > { %3479 = vmatpush3.msra.mxu0 %v4601_v21 }
 0x5a1   : > { %3480 = vmatprep.subr.mxu0 %v4172_v0 }
 0x5a2   : > { %3481 = vmatpush3.msra.mxu0 %v4605_v22 }
 0x5a3   : > { %3485 = vmatprep.subr.mxu0 %v4172_v0 }
 0x60d   : > { %v1739_v8 = vpop.permute.xlu1 %1738 }
 0x65b   : > { %v1732_v24 = vpop.f32.mrf.mxu0 }
 0x65c   : > { %v1741_v25 = vmul.f32 %v1739_v8, %v1732_v24  ;;  %v1736_v28 = vmul.f32 %v1732_v24, %v4752_v3 }
 0x65d   : > { %v3427_v27 = vpop.f32.mrf.mxu0 }
 0x65e   : > { %1743 = vrot.lane.b32.xlu0 %v1741_v25, %s4175_s11 }
 0x6d0   : > { %v1744_v30 = vpop.permute.xlu0 %1743 }
 0x6d1   : > { %v4813_v31 = vadd.f32 %v1744_v30, %v1736_v28 }
 0x6d3   : > { %3820 = vtanh.f32 %v4813_v31 }
 0x6e0   : > { %v3821_v34 = vpop.eup %3820 }
 0x6e1   : > { %1749 = vrot.lane.b32.xlu1 %v3821_v34, %s4174_s29 }
 0x753   : > { %v1750_v35 = vpop.permute.xlu1 %1749 }
 0x754   : > { %v1752_v36 = vmul.f32 %v1750_v35, %v1732_v24 }
 0x756   : > { %1754 = vrot.lane.b32.xlu0 %v1752_v36, %s4175_s11 }
 0x7c8   : > { %v1755_v37 = vpop.permute.xlu0 %1754 }
 0x7c9   : > { %3035 = vst.msk [vmem:[%s4758_s18 + $0x8] sm:$0xff] %vm1404_vm2, %v1755_v37  ;;  %3437 = vmatmul.mubr.msk.f32.vlgmr.msra.gmra.mxu1 %vm1404_vm2, %v1755_v37 }
 0x7ca   : > { %3440 = vmatpush3.msra.mxu1 %v4650_v42  ;;  %3471 = vmatprep.mubr.msk.f32.mxu1 %vm4173_vm0, %v4172_v0 }
 0x7cb   : > { %3441 = vmatprep.subr.mxu1 %v4172_v0 }
 0x7cc   : > { %3442 = vmatpush3.msra.mxu1 %v4654_v43 }
 0x7cd   : > { %3443 = vmatprep.subr.mxu1 %v4172_v0 }
 0x7ce   : > { %3444 = vmatpush3.msra.mxu1 %v4658_v44 }
 0x7cf   : > { %3445 = vmatprep.subr.mxu1 %v4172_v0 }
 0x7d0   : > { %3446 = vmatpush3.msra.mxu1 %v4662_v45 }
 0x7d1   : > { %3447 = vmatprep.subr.mxu1 %v4172_v0 }
 0x7d2   : > { %3448 = vmatpush3.msra.mxu1 %v4666_v46 }
 0x7d3   : > { %3449 = vmatprep.subr.mxu1 %v4172_v0 }
 0x7d4   : > { %3450 = vmatpush3.msra.mxu1 %v4670_v47 }
 0x7d5   : > { %3451 = vmatprep.subr.mxu1 %v4172_v0 }
 0x7d6   : > { %3452 = vmatpush3.msra.mxu1 %v4674_v48 }
 0x7d7   : > { %3453 = vmatprep.subr.mxu1 %v4172_v0 }
 0x7d8   : > { %3454 = vmatpush3.msra.mxu1 %v4678_v49 }
 0x7d9   : > { %3455 = vmatprep.subr.mxu1 %v4172_v0 }
 0x7da   : > { %3456 = vmatpush3.msra.mxu1 %v4682_v50 }
 0x7db   : > { %3457 = vmatprep.subr.mxu1 %v4172_v0 }
 0x7dc   : > { %3458 = vmatpush3.msra.mxu1 %v4685_v51 }
 0x7dd   : > { %3459 = vmatprep.subr.mxu1 %v4172_v0 }
 0x7de   : > { %3460 = vmatpush3.msra.mxu1 %v4688_v52 }
 0x7df   : > { %3461 = vmatprep.subr.mxu1 %v4172_v0 }
 0x7e0   : > { %3462 = vmatpush3.msra.mxu1 %v4692_v53 }
 0x7e1   : > { %3463 = vmatprep.subr.mxu1 %v4172_v0 }
 0x7e2   : > { %3464 = vmatpush3.msra.mxu1 %v4696_v54 }
 0x7e3   : > { %3465 = vmatprep.subr.mxu1 %v4172_v0 }
 0x7e4   : > { %3466 = vmatpush3.msra.mxu1 %v4700_v55 }
 0x7e5   : > { %3467 = vmatprep.subr.mxu1 %v4172_v0 }
 0x7e6   : > { %3468 = vmatpush3.msra.mxu1 %v4704_v56 }
 0x7e7   : > { %3469 = vmatprep.subr.mxu1 %v4172_v0 }
 0x7e8   : > { %3470 = vmatpush3.msra.mxu1 %v4708_v57 }
 0x7e9   : > { %3520 = vmatprep.subr.mxu1 %v4172_v0 }
 0x889   : > { %v1827_v39 = vpop.f32.mrf.mxu1 }
 0x88a   : > { %v1831_v40 = vadd.f32 %v1827_v39, %v4722_v23 }
 0x88b   : > { %v3438_v41 = vpop.f32.mrf.mxu1 }
 0x88c   : > { %v3037_v58 = vmul.f32 -1.442695, %v1831_v40 }
 0x88e   : > { %3822 = vpow2.f32 %v3037_v58 }
 0x88f   : > { %3824 = vtanh.f32 %v1831_v40 }
 0x89b   : > { %v3823_v59 = vpop.eup %3822 }
 0x89c   : > { %v1836_v60 = vadd.f32 1.0, %v3823_v59  ;;  %v3825_v61 = vpop.eup %3824 }
 0x89e   : > { %3826 = vrcp.f32 %v1836_v60 }
 0x8ab   : > { %v3827_v62 = vpop.eup %3826 }
 0x8ac   : > { %v1839_v63 = vsel %vm4732_vm5, %v3825_v61, %v3827_v62 }
 0x8ad   : > { %1912 = vrot.lane.b32.xlu1 %v1839_v63, %s4174_s29  ;;  %3472 = vmatmul.mubr.f32.vlgmr.msra.gmra.mxu1 %v1839_v63 }
 0x8ae   : > { %3521 = vmatpush3.msra.mxu1 %v4593_v19  ;;  %3528 = vmatprep.mubr.msk.f32.mxu1 %vm4173_vm0, %v4172_v0 }
 0x8af   : > { %3522 = vmatprep.subr.mxu1 %v4172_v0 }
 0x8b0   : > { %3523 = vmatpush3.msra.mxu1 %v4597_v20 }
 0x8b1   : > { %3524 = vmatprep.subr.mxu1 %v4172_v0 }
 0x8b2   : > { %3525 = vmatpush3.msra.mxu1 %v4601_v21 }
 0x8b3   : > { %3526 = vmatprep.subr.mxu1 %v4172_v0 }
 0x8b4   : > { %3527 = vmatpush3.msra.mxu1 %v4605_v22 }
 0x8b5   : > { %3531 = vmatprep.subr.mxu1 %v4172_v0 }
 0x91f   : > { %v1913_v23 = vpop.permute.xlu1 %1912 }
 0x96d   : > { %v1906_v1 = vpop.f32.mrf.mxu1 }
 0x96e   : > { %v1915_v2 = vmul.f32 %v1913_v23, %v1906_v1  ;;  %v1910_v4 = vmul.f32 %v1906_v1, %v4813_v31 }
 0x96f   : > { %v3473_v3 = vpop.f32.mrf.mxu1 }
 0x970   : > { %1917 = vrot.lane.b32.xlu0 %v1915_v2, %s4175_s11 }
 0x9e2   : > { %v1918_v5 = vpop.permute.xlu0 %1917 }
 0x9e3   : > { %v4871_v6 = vadd.f32 %v1918_v5, %v1910_v4 }
 0x9e5   : > { %3828 = vtanh.f32 %v4871_v6 }
 0x9f2   : > { %v3829_v7 = vpop.eup %3828 }
 0x9f3   : > { %1923 = vrot.lane.b32.xlu1 %v3829_v7, %s4174_s29 }
 0xa65   : > { %v1924_v9 = vpop.permute.xlu1 %1923 }
 0xa66   : > { %v1926_v10 = vmul.f32 %v1924_v9, %v1906_v1 }
 0xa68   : > { %1928 = vrot.lane.b32.xlu0 %v1926_v10, %s4175_s11 }
 0xada   : > { %v1929_v11 = vpop.permute.xlu0 %1928 }
 0xadb   : > { %3038 = vst.msk [vmem:[%s4758_s18 + $0x10] sm:$0xff] %vm1404_vm2, %v1929_v11  ;;  %3483 = vmatmul.mubr.msk.f32.vlgmr.msra.gmra.mxu0 %vm1404_vm2, %v1929_v11 }
 0xadc   : > { %3486 = vmatpush3.msra.mxu0 %v4650_v42  ;;  %3517 = vmatprep.mubr.msk.f32.mxu0 %vm4173_vm0, %v4172_v0 }
 0xadd   : > { %3487 = vmatprep.subr.mxu0 %v4172_v0 }
 0xade   : > { %3488 = vmatpush3.msra.mxu0 %v4654_v43 }
 0xadf   : > { %3489 = vmatprep.subr.mxu0 %v4172_v0 }
 0xae0   : > { %3490 = vmatpush3.msra.mxu0 %v4658_v44 }
 0xae1   : > { %3491 = vmatprep.subr.mxu0 %v4172_v0 }
 0xae2   : > { %3492 = vmatpush3.msra.mxu0 %v4662_v45 }
 0xae3   : > { %3493 = vmatprep.subr.mxu0 %v4172_v0 }
 0xae4   : > { %3494 = vmatpush3.msra.mxu0 %v4666_v46 }
 0xae5   : > { %3495 = vmatprep.subr.mxu0 %v4172_v0 }
 0xae6   : > { %3496 = vmatpush3.msra.mxu0 %v4670_v47 }
 0xae7   : > { %3497 = vmatprep.subr.mxu0 %v4172_v0 }
 0xae8   : > { %3498 = vmatpush3.msra.mxu0 %v4674_v48 }
 0xae9   : > { %3499 = vmatprep.subr.mxu0 %v4172_v0 }
 0xaea   : > { %3500 = vmatpush3.msra.mxu0 %v4678_v49 }
 0xaeb   : > { %3501 = vmatprep.subr.mxu0 %v4172_v0 }
 0xaec   : > { %3502 = vmatpush3.msra.mxu0 %v4682_v50 }
 0xaed   : > { %3503 = vmatprep.subr.mxu0 %v4172_v0 }
 0xaee   : > { %3504 = vmatpush3.msra.mxu0 %v4685_v51 }
 0xaef   : > { %3505 = vmatprep.subr.mxu0 %v4172_v0 }
 0xaf0   : > { %3506 = vmatpush3.msra.mxu0 %v4688_v52 }
 0xaf1   : > { %3507 = vmatprep.subr.mxu0 %v4172_v0 }
 0xaf2   : > { %3508 = vmatpush3.msra.mxu0 %v4692_v53 }
 0xaf3   : > { %3509 = vmatprep.subr.mxu0 %v4172_v0 }
 0xaf4   : > { %3510 = vmatpush3.msra.mxu0 %v4696_v54 }
 0xaf5   : > { %3511 = vmatprep.subr.mxu0 %v4172_v0 }
 0xaf6   : > { %3512 = vmatpush3.msra.mxu0 %v4700_v55 }
 0xaf7   : > { %3513 = vmatprep.subr.mxu0 %v4172_v0 }
 0xaf8   : > { %3514 = vmatpush3.msra.mxu0 %v4704_v56 }
 0xaf9   : > { %3515 = vmatprep.subr.mxu0 %v4172_v0 }
 0xafa   : > { %3516 = vmatpush3.msra.mxu0 %v4708_v57 }
 0xafb   : > { %3566 = vmatprep.subr.mxu0 %v4172_v0 }
 0xb9b   : > { %v2001_v12 = vpop.f32.mrf.mxu0 }
 0xb9c   : > { %v2005_v13 = vadd.f32 %v2001_v12, %v4720_v15 }
 0xb9d   : > { %v3484_v14 = vpop.f32.mrf.mxu0 }
 0xb9e   : > { %v3040_v16 = vmul.f32 -1.442695, %v2005_v13 }
 0xba0   : > { %3830 = vpow2.f32 %v3040_v16 }
 0xba1   : > { %3832 = vtanh.f32 %v2005_v13 }
 0xbad   : > { %v3831_v17 = vpop.eup %3830 }
 0xbae   : > { %v2010_v18 = vadd.f32 1.0, %v3831_v17  ;;  %v3833_v8 = vpop.eup %3832 }
 0xbb0   : > { %3834 = vrcp.f32 %v2010_v18 }
 0xbbd   : > { %v3835_v24 = vpop.eup %3834 }
 0xbbe   : > { %v2013_v25 = vsel %vm4732_vm5, %v3833_v8, %v3835_v24  ;;  %v3870_v8 = vld [vmem:[#allocation11 + $0x18] sm:$0xff]  ;;  %v3872_v24 = vld [vmem:[#allocation11 + $0x8] sm:$0xff] }
 0xbbf   : > { %2086 = vrot.lane.b32.xlu1 %v2013_v25, %s4174_s29  ;;  %3518 = vmatmul.mubr.f32.vlgmr.msra.gmra.mxu0 %v2013_v25  ;;  %v3873_v25 = vld [vmem:[#allocation11] sm:$0xff] }
 0xbc0   : > { %3567 = vmatpush3.msra.mxu0 %v4593_v19  ;;  %3574 = vmatprep.mubr.msk.f32.mxu0 %vm4173_vm0, %v4172_v0 }
 0xbc1   : > { %3568 = vmatprep.subr.mxu0 %v4172_v0 }
 0xbc2   : > { %3569 = vmatpush3.msra.mxu0 %v4597_v20 }
 0xbc3   : > { %3570 = vmatprep.subr.mxu0 %v4172_v0 }
 0xbc4   : > { %3571 = vmatpush3.msra.mxu0 %v4601_v21 }
 0xbc5   : > { %3572 = vmatprep.subr.mxu0 %v4172_v0 }
 0xbc6   : > { %3573 = vmatpush3.msra.mxu0 %v4605_v22 }
 0xbc7   : > { %3577 = vmatprep.subr.mxu0 %v4172_v0 }
 0xc31   : > { %v2087_v15 = vpop.permute.xlu1 %2086 }
 0xc7f   : > { %v2080_v27 = vpop.f32.mrf.mxu0 }
 0xc80   : > { %v2089_v28 = vmul.f32 %v2087_v15, %v2080_v27  ;;  %v2084_v31 = vmul.f32 %v2080_v27, %v4871_v6 }
 0xc81   : > { %v3519_v30 = vpop.f32.mrf.mxu0 }
 0xc82   : > { %2091 = vrot.lane.b32.xlu0 %v2089_v28, %s4175_s11 }
 0xcf4   : > { %v2092_v34 = vpop.permute.xlu0 %2091 }
 0xcf5   : > { %v4929_v35 = vadd.f32 %v2092_v34, %v2084_v31 }
 0xcf7   : > { %3836 = vtanh.f32 %v4929_v35 }
 0xd04   : > { %v3837_v36 = vpop.eup %3836 }
 0xd05   : > { %2097 = vrot.lane.b32.xlu1 %v3837_v36, %s4174_s29 }
 0xd77   : > { %v2098_v37 = vpop.permute.xlu1 %2097 }
 0xd78   : > { %v2100_v39 = vmul.f32 %v2098_v37, %v2080_v27 }
 0xd7a   : > { %2102 = vrot.lane.b32.xlu0 %v2100_v39, %s4175_s11 }
 0xdec   : > { %v2103_v40 = vpop.permute.xlu0 %2102 }
 0xded   : > { %3041 = vst.msk [vmem:[%s4758_s18 + $0x18] sm:$0xff] %vm1404_vm2, %v2103_v40  ;;  %3529 = vmatmul.mubr.msk.f32.vlgmr.msra.gmra.mxu1 %vm1404_vm2, %v2103_v40 }
 0xdee   : > { %3532 = vmatpush3.msra.mxu1 %v4650_v42  ;;  %3563 = vmatprep.mubr.msk.f32.mxu1 %vm4173_vm0, %v4172_v0 }
 0xdef   : > { %3533 = vmatprep.subr.mxu1 %v4172_v0 }
 0xdf0   : > { %3534 = vmatpush3.msra.mxu1 %v4654_v43 }
 0xdf1   : > { %3535 = vmatprep.subr.mxu1 %v4172_v0 }
 0xdf2   : > { %3536 = vmatpush3.msra.mxu1 %v4658_v44 }
 0xdf3   : > { %3537 = vmatprep.subr.mxu1 %v4172_v0 }
 0xdf4   : > { %3538 = vmatpush3.msra.mxu1 %v4662_v45 }
 0xdf5   : > { %3539 = vmatprep.subr.mxu1 %v4172_v0 }
 0xdf6   : > { %3540 = vmatpush3.msra.mxu1 %v4666_v46 }
 0xdf7   : > { %3541 = vmatprep.subr.mxu1 %v4172_v0 }
 0xdf8   : > { %3542 = vmatpush3.msra.mxu1 %v4670_v47 }
 0xdf9   : > { %3543 = vmatprep.subr.mxu1 %v4172_v0 }
 0xdfa   : > { %3544 = vmatpush3.msra.mxu1 %v4674_v48 }
 0xdfb   : > { %3545 = vmatprep.subr.mxu1 %v4172_v0 }
 0xdfc   : > { %3546 = vmatpush3.msra.mxu1 %v4678_v49 }
 0xdfd   : > { %3547 = vmatprep.subr.mxu1 %v4172_v0 }
 0xdfe   : > { %3548 = vmatpush3.msra.mxu1 %v4682_v50 }
 0xdff   : > { %3549 = vmatprep.subr.mxu1 %v4172_v0 }
 0xe00   : > { %3550 = vmatpush3.msra.mxu1 %v4685_v51 }
 0xe01   : > { %3551 = vmatprep.subr.mxu1 %v4172_v0 }
 0xe02   : > { %3552 = vmatpush3.msra.mxu1 %v4688_v52 }
 0xe03   : > { %3553 = vmatprep.subr.mxu1 %v4172_v0 }
 0xe04   : > { %3554 = vmatpush3.msra.mxu1 %v4692_v53 }
 0xe05   : > { %3555 = vmatprep.subr.mxu1 %v4172_v0 }
 0xe06   : > { %3556 = vmatpush3.msra.mxu1 %v4696_v54 }
 0xe07   : > { %3557 = vmatprep.subr.mxu1 %v4172_v0 }
 0xe08   : > { %3558 = vmatpush3.msra.mxu1 %v4700_v55 }
 0xe09   : > { %3559 = vmatprep.subr.mxu1 %v4172_v0 }
 0xe0a   : > { %3560 = vmatpush3.msra.mxu1 %v4704_v56 }
 0xe0b   : > { %3561 = vmatprep.subr.mxu1 %v4172_v0 }
 0xe0c   : > { %3562 = vmatpush3.msra.mxu1 %v4708_v57 }
 0xe0d   : > { %3612 = vmatprep.subr.mxu1 %v4172_v0 }
 0xead   : > { %v2175_v41 = vpop.f32.mrf.mxu1 }
 0xeae   : > { %v2179_v58 = vadd.f32 %v2175_v41, %v4726_v29 }
 0xeaf   : > { %v3530_v59 = vpop.f32.mrf.mxu1 }
 0xeb0   : > { %v3043_v60 = vmul.f32 -1.442695, %v2179_v58 }
 0xeb2   : > { %3838 = vpow2.f32 %v3043_v60  ;;  %v3874_v60 = vld [vmem:[#allocation13 + $0x78] sm:$0xff] }
 0xeb3   : > { %3840 = vtanh.f32 %v2179_v58 }
 0xebf   : > { %v3839_v61 = vpop.eup %3838 }
 0xec0   : > { %v2184_v62 = vadd.f32 1.0, %v3839_v61  ;;  %v3841_v63 = vpop.eup %3840  ;;  %v3875_v61 = vld [vmem:[#allocation13 + $0x70] sm:$0xff] }
 0xec2   : > { %3842 = vrcp.f32 %v2184_v62  ;;  %v3876_v62 = vld [vmem:[#allocation13 + $0x68] sm:$0xff] }
 0xecf   : > { %v3843_v23 = vpop.eup %3842 }
 0xed0   : > { %v2187_v1 = vsel %vm4732_vm5, %v3841_v63, %v3843_v23  ;;  %v3877_v63 = vld [vmem:[#allocation13 + $0x60] sm:$0xff]  ;;  %v3878_v23 = vld [vmem:[#allocation13 + $0x58] sm:$0xff] }
 0xed1   : > { %2260 = vrot.lane.b32.xlu1 %v2187_v1, %s4174_s29  ;;  %3564 = vmatmul.mubr.f32.vlgmr.msra.gmra.mxu1 %v2187_v1  ;;  %v3879_v1 = vld [vmem:[#allocation13 + $0x50] sm:$0xff] }
 0xed2   : > { %3613 = vmatpush3.msra.mxu1 %v4593_v19  ;;  %3620 = vmatprep.mubr.msk.f32.mxu1 %vm4173_vm0, %v4172_v0 }
 0xed3   : > { %3614 = vmatprep.subr.mxu1 %v4172_v0 }
 0xed4   : > { %3615 = vmatpush3.msra.mxu1 %v4597_v20 }
 0xed5   : > { %3616 = vmatprep.subr.mxu1 %v4172_v0 }
 0xed6   : > { %3617 = vmatpush3.msra.mxu1 %v4601_v21 }
 0xed7   : > { %3618 = vmatprep.subr.mxu1 %v4172_v0 }
 0xed8   : > { %3619 = vmatpush3.msra.mxu1 %v4605_v22 }
 0xed9   : > { %3623 = vmatprep.subr.mxu1 %v4172_v0 }
 0xf43   : > { %v2261_v29 = vpop.permute.xlu1 %2260 }
 0xf91   : > { %v2254_v19 = vpop.f32.mrf.mxu1 }
 0xf92   : > { %v2263_v2 = vmul.f32 %v2261_v29, %v2254_v19  ;;  %v2258_v4 = vmul.f32 %v2254_v19, %v4929_v35  ;;  %v3880_v29 = vld [vmem:[#allocation13 + $0x48] sm:$0xff] }
 0xf93   : > { %v3565_v3 = vpop.f32.mrf.mxu1 }
 0xf94   : > { %2265 = vrot.lane.b32.xlu0 %v2263_v2, %s4175_s11  ;;  %v3882_v2 = vld [vmem:[#allocation13 + $0x38] sm:$0xff]  ;;  %v3883_v3 = vld [vmem:[#allocation13 + $0x30] sm:$0xff] }
0x1006   : > { %v2266_v20 = vpop.permute.xlu0 %2265 }
0x1007   : > { %v4987_v5 = vadd.f32 %v2266_v20, %v2258_v4  ;;  %v3884_v4 = vld [vmem:[#allocation13 + $0x28] sm:$0xff]  ;;  %v3885_v20 = vld [vmem:[#allocation13 + $0x20] sm:$0xff] }
0x1009   : > { %3844 = vtanh.f32 %v4987_v5 }
0x1016   : > { %v3845_v21 = vpop.eup %3844 }
0x1017   : > { %2271 = vrot.lane.b32.xlu1 %v3845_v21, %s4174_s29  ;;  %v3887_v21 = vld [vmem:[#allocation13 + $0x10] sm:$0xff] }
0x1089   : > { %v2272_v22 = vpop.permute.xlu1 %2271 }
0x108a   : > { %v2274_v6 = vmul.f32 %v2272_v22, %v2254_v19  ;;  %v3881_v19 = vld [vmem:[#allocation13 + $0x40] sm:$0xff]  ;;  %v3888_v22 = vld [vmem:[#allocation13 + $0x8] sm:$0xff] }
0x108c   : > { %2276 = vrot.lane.b32.xlu0 %v2274_v6, %s4175_s11  ;;  %v3889_v6 = vld [vmem:[#allocation13] sm:$0xff] }
0x10fe   : > { %v2277_v7 = vpop.permute.xlu0 %2276 }
0x10ff   : > { %3044 = vst.msk [vmem:[%s4758_s18 + $0x20] sm:$0xff] %vm1404_vm2, %v2277_v7  ;;  %3575 = vmatmul.mubr.msk.f32.vlgmr.msra.gmra.mxu0 %vm1404_vm2, %v2277_v7 }
0x1100   : > { %3578 = vmatpush3.msra.mxu0 %v4650_v42  ;;  %3609 = vmatprep.mubr.msk.f32.mxu0 %vm4173_vm0, %v4172_v0 }
0x1101   : > { %3579 = vmatprep.subr.mxu0 %v4172_v0 }
0x1102   : > { %3580 = vmatpush3.msra.mxu0 %v4654_v43 }
0x1103   : > { %3581 = vmatprep.subr.mxu0 %v4172_v0 }
0x1104   : > { %3582 = vmatpush3.msra.mxu0 %v4658_v44 }
0x1105   : > { %3583 = vmatprep.subr.mxu0 %v4172_v0 }
0x1106   : > { %3584 = vmatpush3.msra.mxu0 %v4662_v45 }
0x1107   : > { %3585 = vmatprep.subr.mxu0 %v4172_v0 }
0x1108   : > { %3586 = vmatpush3.msra.mxu0 %v4666_v46 }
0x1109   : > { %3587 = vmatprep.subr.mxu0 %v4172_v0 }
0x110a   : > { %3588 = vmatpush3.msra.mxu0 %v4670_v47 }
0x110b   : > { %3589 = vmatprep.subr.mxu0 %v4172_v0 }
0x110c   : > { %3590 = vmatpush3.msra.mxu0 %v4674_v48 }
0x110d   : > { %3591 = vmatprep.subr.mxu0 %v4172_v0 }
0x110e   : > { %3592 = vmatpush3.msra.mxu0 %v4678_v49 }
0x110f   : > { %3593 = vmatprep.subr.mxu0 %v4172_v0 }
0x1110   : > { %3594 = vmatpush3.msra.mxu0 %v4682_v50 }
0x1111   : > { %3595 = vmatprep.subr.mxu0 %v4172_v0 }
0x1112   : > { %3596 = vmatpush3.msra.mxu0 %v4685_v51 }
0x1113   : > { %3597 = vmatprep.subr.mxu0 %v4172_v0 }
0x1114   : > { %3598 = vmatpush3.msra.mxu0 %v4688_v52 }
0x1115   : > { %3599 = vmatprep.subr.mxu0 %v4172_v0 }
0x1116   : > { %3600 = vmatpush3.msra.mxu0 %v4692_v53 }
0x1117   : > { %3601 = vmatprep.subr.mxu0 %v4172_v0 }
0x1118   : > { %3602 = vmatpush3.msra.mxu0 %v4696_v54 }
0x1119   : > { %3603 = vmatprep.subr.mxu0 %v4172_v0 }
0x111a   : > { %3604 = vmatpush3.msra.mxu0 %v4700_v55 }
0x111b   : > { %3605 = vmatprep.subr.mxu0 %v4172_v0 }
0x111c   : > { %3606 = vmatpush3.msra.mxu0 %v4704_v56 }
0x111d   : > { %3607 = vmatprep.subr.mxu0 %v4172_v0 }
0x111e   : > { %3608 = vmatpush3.msra.mxu0 %v4708_v57 }
0x111f   : > { %3658 = vmatprep.subr.mxu0 %v4172_v0 }
0x11bf   : > { %v2349_v9 = vpop.f32.mrf.mxu0 }
0x11c0   : > { %v2353_v10 = vadd.f32 %v2349_v9, %v4724_v26  ;;  %v3871_v26 = vld [vmem:[#allocation11 + $0x10] sm:$0xff] }
0x11c1   : > { %v3576_v11 = vpop.f32.mrf.mxu0 }
0x11c2   : > { %v3046_v12 = vmul.f32 -1.442695, %v2353_v10 }
0x11c4   : > { %3846 = vpow2.f32 %v3046_v12 }
0x11c5   : > { %3848 = vtanh.f32 %v2353_v10 }
0x11d1   : > { %v3847_v13 = vpop.eup %3846 }
0x11d2   : > { %v2358_v14 = vadd.f32 1.0, %v3847_v13  ;;  %v3849_v16 = vpop.eup %3848 }
0x11d4   : > { %3850 = vrcp.f32 %v2358_v14 }
0x11e1   : > { %v3851_v17 = vpop.eup %3850 }
0x11e2   : > { %v2361_v18 = vsel %vm4732_vm5, %v3849_v16, %v3851_v17 }
0x11e3   : > { %2434 = vrot.lane.b32.xlu1 %v2361_v18, %s4174_s29  ;;  %3610 = vmatmul.mubr.f32.vlgmr.msra.gmra.mxu0 %v2361_v18 }
0x11e4   : > { %3659 = vmatpush3.msra.mxu0 %v3870_v8  ;;  %3666 = vmatprep.mubr.msk.f32.mxu0 %vm4173_vm0, %v4172_v0 }
0x11e5   : > { %3660 = vmatprep.subr.mxu0 %v4172_v0 }
0x11e6   : > { %3661 = vmatpush3.msra.mxu0 %v3871_v26 }
0x11e7   : > { %3662 = vmatprep.subr.mxu0 %v4172_v0 }
0x11e8   : > { %3663 = vmatpush3.msra.mxu0 %v3872_v24 }
0x11e9   : > { %3664 = vmatprep.subr.mxu0 %v4172_v0 }
0x11ea   : > { %3665 = vmatpush3.msra.mxu0 %v3873_v25 }
0x11eb   : > { %3669 = vmatprep.subr.mxu0 %v4172_v0 }
0x1255   : > { %v2435_v15 = vpop.permute.xlu1 %2434 }
0x12a3   : > { %v2428_v27 = vpop.f32.mrf.mxu0 }
0x12a4   : > { %v2437_v28 = vmul.f32 %v2435_v15, %v2428_v27  ;;  %v2432_v31 = vmul.f32 %v2428_v27, %v4987_v5  ;;  %v3886_v5 = vld [vmem:[#allocation13 + $0x18] sm:$0xff] }
0x12a5   : > { %v3611_v30 = vpop.f32.mrf.mxu0 }
0x12a6   : > { %2439 = vrot.lane.b32.xlu0 %v2437_v28, %s4175_s11 }
0x1318   : > { %v2440_v34 = vpop.permute.xlu0 %2439 }
0x1319   : > { %v2442_v35 = vadd.f32 %v2440_v34, %v2432_v31 }
0x131b   : > { %3852 = vtanh.f32 %v2442_v35 }
0x1328   : > { %v3853_v36 = vpop.eup %3852 }
0x1329   : > { %2445 = vrot.lane.b32.xlu1 %v3853_v36, %s4174_s29 }
0x139b   : > { %v2446_v37 = vpop.permute.xlu1 %2445 }
0x139c   : > { %v2448_v39 = vmul.f32 %v2446_v37, %v2428_v27 }
0x139e   : > { %2450 = vrot.lane.b32.xlu0 %v2448_v39, %s4175_s11 }
0x1410   : > { %v2451_v40 = vpop.permute.xlu0 %2450 }
0x1411   : > { %3047 = vst.msk [vmem:[%s4758_s18 + $0x28] sm:$0xff] %vm1404_vm2, %v2451_v40  ;;  %3621 = vmatmul.mubr.msk.f32.vlgmr.msra.gmra.mxu1 %vm1404_vm2, %v2451_v40 }
0x1412   : > { %3624 = vmatpush3.msra.mxu1 %v4650_v42  ;;  %3655 = vmatprep.mubr.msk.f32.mxu1 %vm4173_vm0, %v4172_v0 }
0x1413   : > { %3625 = vmatprep.subr.mxu1 %v4172_v0 }
0x1414   : > { %3626 = vmatpush3.msra.mxu1 %v4654_v43 }
0x1415   : > { %3627 = vmatprep.subr.mxu1 %v4172_v0 }
0x1416   : > { %3628 = vmatpush3.msra.mxu1 %v4658_v44 }
0x1417   : > { %3629 = vmatprep.subr.mxu1 %v4172_v0 }
0x1418   : > { %3630 = vmatpush3.msra.mxu1 %v4662_v45 }
0x1419   : > { %3631 = vmatprep.subr.mxu1 %v4172_v0 }
0x141a   : > { %3632 = vmatpush3.msra.mxu1 %v4666_v46 }
0x141b   : > { %3633 = vmatprep.subr.mxu1 %v4172_v0 }
0x141c   : > { %3634 = vmatpush3.msra.mxu1 %v4670_v47 }
0x141d   : > { %3635 = vmatprep.subr.mxu1 %v4172_v0 }
0x141e   : > { %3636 = vmatpush3.msra.mxu1 %v4674_v48 }
0x141f   : > { %3637 = vmatprep.subr.mxu1 %v4172_v0 }
0x1420   : > { %3638 = vmatpush3.msra.mxu1 %v4678_v49 }
0x1421   : > { %3639 = vmatprep.subr.mxu1 %v4172_v0 }
0x1422   : > { %3640 = vmatpush3.msra.mxu1 %v4682_v50 }
0x1423   : > { %3641 = vmatprep.subr.mxu1 %v4172_v0 }
0x1424   : > { %3642 = vmatpush3.msra.mxu1 %v4685_v51 }
0x1425   : > { %3643 = vmatprep.subr.mxu1 %v4172_v0 }
0x1426   : > { %3644 = vmatpush3.msra.mxu1 %v4688_v52 }
0x1427   : > { %3645 = vmatprep.subr.mxu1 %v4172_v0 }
0x1428   : > { %3646 = vmatpush3.msra.mxu1 %v4692_v53 }
0x1429   : > { %3647 = vmatprep.subr.mxu1 %v4172_v0 }
0x142a   : > { %3648 = vmatpush3.msra.mxu1 %v4696_v54 }
0x142b   : > { %3649 = vmatprep.subr.mxu1 %v4172_v0 }
0x142c   : > { %3650 = vmatpush3.msra.mxu1 %v4700_v55 }
0x142d   : > { %3651 = vmatprep.subr.mxu1 %v4172_v0 }
0x142e   : > { %3652 = vmatpush3.msra.mxu1 %v4704_v56 }
0x142f   : > { %3653 = vmatprep.subr.mxu1 %v4172_v0 }
0x1430   : > { %3654 = vmatpush3.msra.mxu1 %v4708_v57 }
0x14d1   : > { %v2523_v42 = vpop.f32.mrf.mxu1 }
0x14d2   : > { %v2527_v43 = vadd.f32 %v2523_v42, %v4730_v33 }
0x14d3   : > { %v3622_v44 = vpop.f32.mrf.mxu1 }
0x14d4   : > { %v3049_v45 = vmul.f32 -1.442695, %v2527_v43 }
0x14d6   : > { %3854 = vpow2.f32 %v3049_v45 }
0x14d7   : > { %3856 = vtanh.f32 %v2527_v43 }
0x14e3   : > { %v3855_v46 = vpop.eup %3854 }
0x14e4   : > { %v2532_v47 = vadd.f32 1.0, %v3855_v46  ;;  %v3857_v48 = vpop.eup %3856 }
0x14e6   : > { %3858 = vrcp.f32 %v2532_v47 }
0x14f3   : > { %v3859_v49 = vpop.eup %3858 }
0x14f4   : > { %v2535_v50 = vsel %vm4732_vm5, %v3857_v48, %v3859_v49 }
0x14f5   : > { %2608 = vrot.lane.b32.xlu1 %v2535_v50, %s4174_s29  ;;  %3656 = vmatmul.mubr.f32.vlgmr.msra.gmra.mxu1 %v2535_v50 }
0x1567   : > { %v2609_v51 = vpop.permute.xlu1 %2608 }
0x15b5   : > { %v2602_v52 = vpop.f32.mrf.mxu1 }
0x15b6   : > { %v2611_v53 = vmul.f32 %v2609_v51, %v2602_v52  ;;  %v2606_v55 = vmul.f32 %v2602_v52, %v2442_v35 }
0x15b7   : > { %v3657_v54 = vpop.f32.mrf.mxu1 }
0x15b8   : > { %2613 = vrot.lane.b32.xlu0 %v2611_v53, %s4175_s11 }
0x162a   : > { %v2614_v56 = vpop.permute.xlu0 %2613 }
0x162b   : > { %v5084_v57 = vadd.f32 %v2614_v56, %v2606_v55 }
0x162d   : > { %3860 = vtanh.f32 %v5084_v57 }
0x163a   : > { %v3861_v33 = vpop.eup %3860 }
0x163b   : > { %2619 = vrot.lane.b32.xlu1 %v3861_v33, %s4174_s29 }
0x16ad   : > { %v2620_v41 = vpop.permute.xlu1 %2619 }
0x16ae   : > { %v2622_v58 = vmul.f32 %v2620_v41, %v2602_v52 }
0x16b0   : > { %2624 = vrot.lane.b32.xlu0 %v2622_v58, %s4175_s11 }
0x1722   : > { %v2625_v59 = vpop.permute.xlu0 %2624 }
0x1723   : > { %3050 = vst.msk [vmem:[%s4758_s18 + $0x30] sm:$0xff] %vm1404_vm2, %v2625_v59  ;;  %3667 = vmatmul.mubr.msk.f32.vlgmr.msra.gmra.mxu0 %vm1404_vm2, %v2625_v59 }
0x1724   : > { %3670 = vmatpush3.msra.mxu0 %v3874_v60  ;;  %3701 = vmatprep.mubr.msk.f32.mxu0 %vm4173_vm0, %v4172_v0 }
0x1725   : > { %3671 = vmatprep.subr.mxu0 %v4172_v0 }
0x1726   : > { %3672 = vmatpush3.msra.mxu0 %v3875_v61 }
0x1727   : > { %3673 = vmatprep.subr.mxu0 %v4172_v0 }
0x1728   : > { %3674 = vmatpush3.msra.mxu0 %v3876_v62 }
0x1729   : > { %3675 = vmatprep.subr.mxu0 %v4172_v0 }
0x172a   : > { %3676 = vmatpush3.msra.mxu0 %v3877_v63 }
0x172b   : > { %3677 = vmatprep.subr.mxu0 %v4172_v0 }
0x172c   : > { %3678 = vmatpush3.msra.mxu0 %v3878_v23 }
0x172d   : > { %3679 = vmatprep.subr.mxu0 %v4172_v0 }
0x172e   : > { %3680 = vmatpush3.msra.mxu0 %v3879_v1 }
0x172f   : > { %3681 = vmatprep.subr.mxu0 %v4172_v0 }
0x1730   : > { %3682 = vmatpush3.msra.mxu0 %v3880_v29 }
0x1731   : > { %3683 = vmatprep.subr.mxu0 %v4172_v0 }
0x1732   : > { %3684 = vmatpush3.msra.mxu0 %v3881_v19 }
0x1733   : > { %3685 = vmatprep.subr.mxu0 %v4172_v0 }
0x1734   : > { %3686 = vmatpush3.msra.mxu0 %v3882_v2 }
0x1735   : > { %3687 = vmatprep.subr.mxu0 %v4172_v0 }
0x1736   : > { %3688 = vmatpush3.msra.mxu0 %v3883_v3 }
0x1737   : > { %3689 = vmatprep.subr.mxu0 %v4172_v0 }
0x1738   : > { %3690 = vmatpush3.msra.mxu0 %v3884_v4 }
0x1739   : > { %3691 = vmatprep.subr.mxu0 %v4172_v0 }
0x173a   : > { %3692 = vmatpush3.msra.mxu0 %v3885_v20 }
0x173b   : > { %3693 = vmatprep.subr.mxu0 %v4172_v0 }
0x173c   : > { %3694 = vmatpush3.msra.mxu0 %v3886_v5 }
0x173d   : > { %3695 = vmatprep.subr.mxu0 %v4172_v0 }
0x173e   : > { %3696 = vmatpush3.msra.mxu0 %v3887_v21 }
0x173f   : > { %3697 = vmatprep.subr.mxu0 %v4172_v0 }
0x1740   : > { %3698 = vmatpush3.msra.mxu0 %v3888_v22 }
0x1741   : > { %3699 = vmatprep.subr.mxu0 %v4172_v0 }
0x1742   : > { %3700 = vmatpush3.msra.mxu0 %v3889_v6 }
0x17e3   : > { %v2697_v7 = vpop.f32.mrf.mxu0 }
0x17e4   : > { %v2701_v9 = vadd.f32 %v2697_v7, %v4728_v32 }
0x17e5   : > { %v3668_v10 = vpop.f32.mrf.mxu0 }
0x17e6   : > { %v3052_v11 = vmul.f32 -1.442695, %v2701_v9 }
0x17e8   : > { %3862 = vpow2.f32 %v3052_v11 }
0x17e9   : > { %3864 = vtanh.f32 %v2701_v9 }
0x17f5   : > { %v3863_v12 = vpop.eup %3862 }
0x17f6   : > { %v2706_v13 = vadd.f32 1.0, %v3863_v12  ;;  %v3865_v14 = vpop.eup %3864 }
0x17f8   : > { %3866 = vrcp.f32 %v2706_v13 }
0x1805   : > { %v3867_v16 = vpop.eup %3866 }
0x1806   : > { %v2709_v17 = vsel %vm4732_vm5, %v3865_v14, %v3867_v16 }
0x1807   : > { %2782 = vrot.lane.b32.xlu1 %v2709_v17, %s4174_s29  ;;  %3702 = vmatmul.mubr.f32.vlgmr.msra.gmra.mxu0 %v2709_v17 }
0x1879   : > { %v2783_v0 = vpop.permute.xlu1 %2782 }
0x18c7   : > { %v2776_v18 = vpop.f32.mrf.mxu0 }
0x18c8   : > { %v2785_v32 = vmul.f32 %v2783_v0, %v2776_v18  ;;  %v2780_v26 = vmul.f32 %v2776_v18, %v5084_v57 }
0x18c9   : > { %v3703_v8 = vpop.f32.mrf.mxu0 }
0x18ca   : > { %2787 = vrot.lane.b32.xlu0 %v2785_v32, %s4175_s11 }
0x193c   : > { %v2788_v24 = vpop.permute.xlu0 %2787 }
0x193d   : > { %v2790_v25 = vadd.f32 %v2788_v24, %v2780_v26 }
0x193f   : > { %3868 = vtanh.f32 %v2790_v25 }
0x194c   : > { %v3869_v38 = vpop.eup %3868 }
0x194d   : > { %2793 = vrot.lane.b32.xlu1 %v3869_v38, %s4174_s29 }
0x19bf   : > { %v2794_v15 = vpop.permute.xlu1 %2793 }
0x19c0   : > { %v2796_v27 = vmul.f32 %v2794_v15, %v2776_v18 }
0x19c2   : > { %2798 = vrot.lane.b32.xlu0 %v2796_v27, %s4175_s11 }
0x1a34   : > { %v2799_v28 = vpop.permute.xlu0 %2798 }
0x1a35   : > { %3053 = vst.msk [vmem:[%s4758_s18 + $0x38] sm:$0xff] %vm1404_vm2, %v2799_v28 }
0x1a36   : > { %4093 = shalt.err (!%p4090_p6)
}
0x1a37   : > { %s4094_s22 = scalar_lea.hbm %s5124_s17, 1024  ;;  %s4098_s9 = scalar_lea.hbm %s5245_s25, 2048 }
0x1a38   : > { %p4095_p13 = scmp.ne.s32.totalorder %s5124_s17, %s4094_s22  ;;  %p4099_p7 = scmp.lt.s32.totalorder %s5124_s17, %s5245_s25 }
0x1a39   : > { %p4100_p8 = scmp.lt.s32.totalorder %s4098_s9, %s4094_s22 }
0x1a3a   : > { %p4096_p0 = pnand %p4095_p13, %p5246_p12 }
0x1a3b   : > { %p4101_p10 = por %p4100_p8, %p4099_p7 }
0x1a3c   : > { %p4097_p3 = pneg %p4096_p0 }
0x1a3e   : > { %p4102_p1 = pnand %p4101_p10, %p4097_p3 }
0x1a40   : > { %4105 = shalt.err (!%p4102_p1)
}
0x1a41   : > { %s4177_s30 = smov 128   ;;  %s4178_s8 = smov 256  }
0x1a42   : > { %s4179_s28 = smov 8  }
0x1a43   : > { %3724 = dma.vmem_to_hbm [thread:$0]  (%p5246_p12), %s5119_s26, 1024, %s5124_s17, %s2804_s14, %s4177_s30, %s4178_s8, %s4179_s28  }
0x1a44 PF: > { %s5247_s15 = sld [smem:[#allocation21_spill]]  ;;  %p5250_p2 = scmp.ge.s32.totalorder %s4160_s12, 2 }
0x1a45   : > { %s5248_s29 = sld [smem:[#allocation26_spill]] }
0x1a4a   : > { %s2831_s11 = sand.u32 1, %s5247_s15  }
0x1a4b   : > { %p5249_p11 = scmp.ne.s32.totalorder %s5248_s29, 0  ;;  %s2832_s18 = scalar_lea.sflag [#allocation4], %s2831_s11 }
0x1a4d   : > { %p3750_p4 = pnand %p5250_p2, %p5249_p11 }
0x1a4f   : > { %p3751_p5 = pneg %p3750_p4 }
0x1a51   : > { %4143 = dma.done.wait (%p3751_p5), %s2832_s18, 1024  }
0x1a52   : > { %4145 = vsyncadd (%p3751_p5), %s2832_s18, 4294966272  ;;  %s5251_s12 = sld [smem:[#allocation23_spill]]  ;;  %s5254_s30 = smov %s4152_s10 }
0x1a53   : > { %s5252_s19 = sld [smem:[#allocation22_spill]] }
0x1a54   : > { %s5253_s11 = sld [smem:[#allocation24_spill]] }
0x1a58   : > { %p29_p9 = scmp.ge.s32.totalorder %s5251_s12, 4  }
0x1a59   : > { %s5255_s10 = smov %s5252_s19 }
0x1a5a   :  { %31 = sbr.rel (!%p29_p9) target bundleno = 18 (0x12), region = 157 }
0x1a5f   :  { %2837 = vsyncpa [#allocation3], 1 }
0x1a60   :  { %2839 = vsyncpa [#allocation3 + $0x1], 1 }
0x1a61   :  { %2840 = vsyncpa [#allocation6], 1 }
0x1a62   :  { %2842 = vsyncpa [#allocation6 + $0x1], 1 }
0x1a63   :  { %2843 = vsyncpa [#allocation9], 1 }
0x1a64   :  { %2845 = vsyncpa [#allocation9 + $0x1], 1 }
0x1a65   :  { %2846 = vsyncpa [#allocation12], 1 }
0x1a66   :  { %2847 = vsyncpa [#allocation4], 1 }
0x1a67   :  { %2849 = vsyncpa [#allocation4 + $0x1], 1 }

</bundles_post_ra>
